<compile_context>
chip_gen: v6e
topology: v6e:2x2x1
jax: 0.10.0
libtpu: 0.0.40
codegen_flags: <defaults>
</compile_context>

<pallas_src>
import functools

import jax
import jax.numpy as jnp
from jax import lax
from jax.experimental import pallas as pl
from jax.experimental.pallas import tpu as pltpu


def _take_diag_lanes(x):
    """Lane-dense diagonal / transpose-to-lanes helper.

    For x of shape (R, R): returns (1, R) with the diagonal x[c, c].
    For x of shape (R, 1): returns (1, R) with x[c, 0] (column -> lane transpose).
    Uses iota mask + sublane reduce only (no explicit transpose op).
    """
    rows = x.shape[0]
    r = lax.broadcasted_iota(jnp.int32, (rows, rows), 0)
    c = lax.broadcasted_iota(jnp.int32, (rows, rows), 1)
    return jnp.sum(jnp.where(r == c, x, 0.0), axis=0, keepdims=True)


def _clip_loss_tiles_kernel(scale_ref, img_ref, txt_ref,
                            row_out_ref, col_out_ref,
                            row_m, row_s, diag_s):
    # scale_ref:   SMEM (1,) f32 logit scale.
    # img_ref:     (block, D) image-feature rows of tile i (input dtype).
    # txt_ref:     (block, D) text-feature  rows of tile j (input dtype).
    # row_out_ref: (1, 2, block) f32 lane-dense per-row stats of tile i:
    #              slab 0 = row logsumexp, slab 1 = scaled diagonal logit.
    # col_out_ref: (1, 2, block) f32 lane-dense per-column partial stats of (i, j):
    #              slab 0 = column max, slab 1 = column sum-exp.
    # row_m/row_s: (block, 1) f32 VMEM scratch (online row logsumexp state).
    # diag_s:      (1, block) f32 VMEM scratch (diagonal logits, written at i == j).
    i = pl.program_id(0)
    j = pl.program_id(1)
    nj = pl.num_programs(1)

    scale = scale_ref[0]

    # (block, block) logits tile: contract last dims of both operands on the MXU
    # (no txt.T relayout), f32 accumulation; temperature applied on the f32 tile.
    sim = lax.dot_general(
        img_ref[...], txt_ref[...],
        dimension_numbers=(((1,), (1,)), ((), ())),
        preferred_element_type=jnp.float32,
    )
    logits = sim * scale

    # ---- row direction (logits_per_image): online logsumexp across j ----
    @pl.when(j == 0)
    def _init_rows():
        row_m[...] = jnp.full_like(row_m, -jnp.inf)
        row_s[...] = jnp.zeros_like(row_s)

    t_max = jnp.max(logits, axis=-1, keepdims=True)              # (block, 1)
    m_new = jnp.maximum(row_m[...], t_max)
    row_s[...] = (row_s[...] * jnp.exp(row_m[...] - m_new)
                  + jnp.sum(jnp.exp(logits - m_new), axis=-1, keepdims=True))
    row_m[...] = m_new

    # ---- column direction (logits_per_text): lane-dense partial stats ----
    c_max = jnp.max(logits, axis=0, keepdims=True)               # (1, block)
    c_sum = jnp.sum(jnp.exp(logits - c_max), axis=0, keepdims=True)
    col_out_ref[0] = jnp.concatenate([c_max, c_sum], axis=0)     # one (2, block) store

    # ---- diagonal (target-class logits) from the resident f32 logits tile ----
    @pl.when(i == j)
    def _diag():
        diag_s[...] = _take_diag_lanes(logits)                   # (1, block)

    # ---- finalize row stats: single lane-dense (2, block) store per row tile ----
    @pl.when(j == nj - 1)
    def _finalize_rows():
        lse_col = jnp.log(row_s[...]) + row_m[...]               # (block, 1)
        lse_row = _take_diag_lanes(lse_col)                      # (1, block) lane-dense
        row_out_ref[0] = jnp.concatenate([lse_row, diag_s[...]], axis=0)


def _pick_block_and_vmem(n, d, itemsize):
    """Largest tile that fits this generation's VMEM, plus a per-gen vmem limit."""
    vmem_cap = None
    try:
        info = pltpu.get_tpu_info()
        vmem_cap = getattr(info, "vmem_capacity_bytes", None)
    except Exception:
        vmem_cap = None
    if not vmem_cap:
        vmem_cap = 64 * 1024 * 1024                 # conservative (v7x per-TC VMEM)

    # ~75% of physical VMEM, capped at 96 MiB: 96 MiB on v5e/v6e, 48 MiB on v7x.
    vmem_limit = min((int(vmem_cap) * 3) // 4, 96 * 1024 * 1024)
    budget = (vmem_limit * 7) // 10                 # headroom for compiler temporaries

    def vmem_need(b):
        return (4 * b * d * itemsize                # img + txt tiles, double-buffered
                + 5 * b * b * 4                     # f32 logits + exp temporaries
                + 16 * b * 4)                       # row/col/diag stats + out blocks

    block = None
    for cand in (1024, 512, 256, 128):
        if n % cand == 0 and vmem_need(cand) <= budget:
            block = cand
            break
    if block is None:
        block = n                                   # single full block for odd small N
    return block, vmem_limit


@functools.partial(jax.jit, static_argnames=("block", "precast_bf16"))
def clip_loss(image_features, text_features, logit_scale, *,
              block=None, precast_bf16=False):
    """ClipLoss.forward (single device, output_dict=False)."""
    n, d = image_features.shape
    assert text_features.shape == (n, d)

    if precast_bf16 and image_features.dtype == jnp.float32:
        # MXU is bf16-native on v5e/v6e/v7x; accumulation stays f32 inside the kernel.
        image_features = image_features.astype(jnp.bfloat16)
        text_features = text_features.astype(jnp.bfloat16)

    itemsize = jnp.dtype(image_features.dtype).itemsize
    auto_block, vmem_limit = _pick_block_and_vmem(n, d, itemsize)
    if block is None:
        block = auto_block
    assert n % block == 0, "batch size must be divisible by the tile size"
    nt = n // block

    scale = jnp.asarray(logit_scale, jnp.float32).reshape(1)

    out_shapes = (
        jax.ShapeDtypeStruct((nt, 2, block), jnp.float32),  # [row lse ; scaled diag]
        jax.ShapeDtypeStruct((nt, 2, n), jnp.float32),      # [col max ; col sum-exp]
    )
    out_specs = (
        pl.BlockSpec((1, 2, block), lambda i, j: (i, 0, 0)),
        pl.BlockSpec((1, 2, block), lambda i, j: (i, 0, j)),
    )
    in_specs = [
        pl.BlockSpec(memory_space=pltpu.SMEM),              # logit_scale scalar
        pl.BlockSpec((block, d), lambda i, j: (i, 0)),      # image feature rows (tile i)
        # NOTE: if profiling shows exposed DMA, add pipeline_mode=pl.Buffered(3)
        # here (the text tile is the only operand changing every grid step).
        pl.BlockSpec((block, d), lambda i, j: (j, 0)),      # text feature rows (tile j)
    ]

    row_out, col_out = pl.pallas_call(
        _clip_loss_tiles_kernel,
        out_shape=out_shapes,
        grid=(nt, nt),
        in_specs=in_specs,
        out_specs=out_specs,
        scratch_shapes=[
            pltpu.VMEM((block, 1), jnp.float32),   # running row max
            pltpu.VMEM((block, 1), jnp.float32),   # running row sum-exp
            pltpu.VMEM((1, block), jnp.float32),   # diagonal logits (lane-dense)
        ],
        compiler_params=pltpu.CompilerParams(
            # row-tile axis is independent (megacore-shardable on v7x);
            # column axis carries the online-logsumexp accumulation.
            dimension_semantics=("parallel", "arbitrary"),
            vmem_limit_bytes=vmem_limit,
        ),
        cost_estimate=pl.CostEstimate(
            flops=2 * n * n * d,
            transcendentals=2 * n * n,
            bytes_accessed=(nt + 1) * n * d * itemsize + (2 * n + 2 * nt * n) * 4,
        ),
    )(scale, image_features, text_features)

    # Tiny O(N * N/block) final combine in plain JAX.
    row_lse = row_out[:, 0, :]
    row_diag = row_out[:, 1, :]
    col_max = col_out[:, 0, :]
    col_sum = col_out[:, 1, :]

    lse_rows = jnp.sum(row_lse)
    diag_sum = jnp.sum(row_diag)
    m = jnp.max(col_max, axis=0)                                   # (n,)
    s = jnp.sum(col_sum * jnp.exp(col_max - m[None, :]), axis=0)   # (n,)
    lse_cols = jnp.sum(jnp.log(s) + m)

    return (lse_rows + lse_cols - 2.0 * diag_sum) / (2.0 * n)


def _clip_loss_ref(image_features, text_features, logit_scale):
    # Pure-JAX reference for correctness checking.
    logits = logit_scale * jnp.dot(
        image_features.astype(jnp.float32),
        text_features.astype(jnp.float32).T,
        precision=jax.lax.Precision.HIGHEST,
    )
    labels = jnp.arange(logits.shape[0])
    lp_i = jax.nn.log_softmax(logits, axis=-1)
    lp_t = jax.nn.log_softmax(logits.T, axis=-1)
    ce_i = -jnp.mean(lp_i[labels, labels])
    ce_t = -jnp.mean(lp_t[labels, labels])
    return (ce_i + ce_t) / 2.0


if __name__ == "__main__":
    key = jax.random.PRNGKey(0)
    k1, k2 = jax.random.split(key)
    N, D = 256, 128  # small batch / embed dim (multiple-of-128 to exercise tiling)

    # L2-normalized "features" as produced by the CLIP towers.
    img = jax.random.normal(k1, (N, D), dtype=jnp.float32)
    txt = jax.random.normal(k2, (N, D), dtype=jnp.float32)
    img = img / jnp.linalg.norm(img, axis=-1, keepdims=True)
    txt = txt / jnp.linalg.norm(txt, axis=-1, keepdims=True)

    # logit_scale = exp(log(1/0.07)), CLIP's learnable temperature init.
    logit_scale = jnp.float32(1.0 / 0.07)

    ref = _clip_loss_ref(img, txt, logit_scale)

    # Explicit small tile: 2x2 grid of 128x128 logits tiles (exercises online lse,
    # diagonal stash, and the cross-row-tile column combine).
    loss = clip_loss(img, txt, logit_scale, block=128)
    jax.block_until_ready(loss)
    assert jnp.allclose(loss, ref, atol=1e-3, rtol=1e-3), (loss, ref)

    # Auto tile / VMEM selection (single 256-wide tile here).
    loss_auto = clip_loss(img, txt, logit_scale)
    jax.block_until_ready(loss_auto)
    assert jnp.allclose(loss_auto, ref, atol=1e-3, rtol=1e-3), (loss_auto, ref)

    # bf16 features go straight to the MXU (no f32 cast inside the kernel).
    img_bf = img.astype(jnp.bfloat16)
    txt_bf = txt.astype(jnp.bfloat16)
    ref_bf = _clip_loss_ref(img_bf, txt_bf, logit_scale)
    loss_bf = clip_loss(img_bf, txt_bf, logit_scale, block=128)
    jax.block_until_ready(loss_bf)
    assert jnp.allclose(loss_bf, ref_bf, atol=2e-2, rtol=2e-2), (loss_bf, ref_bf)

    # Opt-in bf16 pre-cast of f32 features (halves HBM/VMEM, bf16-native MXU).
    loss_pc = clip_loss(img, txt, logit_scale, precast_bf16=True)
    jax.block_until_ready(loss_pc)
    assert jnp.allclose(loss_pc, ref_bf, atol=2e-2, rtol=2e-2), (loss_pc, ref_bf)

    print("KERNEL_OK")
</pallas_src>

<mosaic_0001>
module attributes {stable_mosaic.version = 11 : i64} {
  func.func @_clip_loss_tiles_kernel(%arg0: i32, %arg1: i32, %arg2: memref<1xf32, #tpu.memory_space<smem>>, %arg3: memref<128x128xf32, #tpu.memory_space<vmem>>, %arg4: memref<128x128xf32, #tpu.memory_space<vmem>>, %arg5: memref<1x2x128xf32, #tpu.memory_space<vmem>>, %arg6: memref<1x2x128xf32, #tpu.memory_space<vmem>>, %arg7: memref<128x1xf32, #tpu.memory_space<vmem>>, %arg8: memref<128x1xf32, #tpu.memory_space<vmem>>, %arg9: memref<1x128xf32, #tpu.memory_space<vmem>>) attributes {dimension_semantics = [#tpu.dimension_semantics<parallel>, #tpu.dimension_semantics<arbitrary>], iteration_bounds = array<i64: 2, 2>, scalar_prefetch = 0 : i64, scratch_operands = 3 : i64, tpu.core_type = #tpu.core_type<tc>, window_params = [{transform_indices = @transform_0, window_bounds = array<i64: 1>}, {transform_indices = @transform_1, window_bounds = array<i64: 128, 128>}, {transform_indices = @transform_2, window_bounds = array<i64: 128, 128>}, {transform_indices = @transform_3, window_bounds = array<i64: 1, 2, 128>}, {transform_indices = @transform_4, window_bounds = array<i64: 1, 2, 128>}]} {
    %c0 = arith.constant 0 : index
    %0 = memref.load %arg2[%c0] : memref<1xf32, #tpu.memory_space<smem>>
    %c0_0 = arith.constant 0 : index
    %c0_1 = arith.constant 0 : index
    %1 = vector.load %arg3[%c0_0, %c0_1] : memref<128x128xf32, #tpu.memory_space<vmem>>, vector<128x128xf32>
    %c0_2 = arith.constant 0 : index
    %c0_3 = arith.constant 0 : index
    %2 = vector.load %arg4[%c0_2, %c0_3] : memref<128x128xf32, #tpu.memory_space<vmem>>, vector<128x128xf32>
    %cst = arith.constant dense<0.000000e+00> : vector<128x128xf32>
    %3 = tpu.matmul %1, %2, %cst {dimension_numbers = #tpu.dot_dimension_numbers<[1], [1], [0], [0], [0, 0, 1, 0], [], []>} : vector<128x128xf32>, vector<128x128xf32>, vector<128x128xf32> -> vector<128x128xf32>
    %4 = vector.broadcast %0 : f32 to vector<128x128xf32>
    %5 = arith.mulf %3, %4 : vector<128x128xf32>
    %c0_i32 = arith.constant 0 : i32
    %6 = arith.cmpi eq, %arg1, %c0_i32 : i32
    %7 = arith.extui %6 : i1 to i32
    %c0_i32_4 = arith.constant 0 : i32
    %8 = arith.cmpi ne, %7, %c0_i32_4 : i32
    scf.if %8 {
      %cst_24 = arith.constant 0xFF800000 : f32
      %43 = vector.broadcast %cst_24 : f32 to vector<128x1xf32>
      %c0_25 = arith.constant 0 : index
      %c0_26 = arith.constant 0 : index
      %44 = vector.load %arg7[%c0_25, %c0_26] : memref<128x1xf32, #tpu.memory_space<vmem>>, vector<128x1xf32>
      tpu.vector_store %arg7[%c0_25, %c0_26], %43 {strides = array<i32>} : memref<128x1xf32, #tpu.memory_space<vmem>>, vector<128x1xf32>,
      %cst_27 = arith.constant 0.000000e+00 : f32
      %45 = vector.broadcast %cst_27 : f32 to vector<128x1xf32>
      %c0_28 = arith.constant 0 : index
      %c0_29 = arith.constant 0 : index
      %46 = vector.load %arg8[%c0_28, %c0_29] : memref<128x1xf32, #tpu.memory_space<vmem>>, vector<128x1xf32>
      tpu.vector_store %arg8[%c0_28, %c0_29], %45 {strides = array<i32>} : memref<128x1xf32, #tpu.memory_space<vmem>>, vector<128x1xf32>,
    } else {
    }
    %cst_5 = arith.constant dense<0xFF800000> : vector<128xf32>
    %9 = vector.multi_reduction <maximumf>, %5, %cst_5 [1] : vector<128x128xf32> to vector<128xf32>
    %10 = vector.shape_cast %9 : vector<128xf32> to vector<128x1xf32>
    %c0_6 = arith.constant 0 : index
    %c0_7 = arith.constant 0 : index
    %11 = vector.load %arg7[%c0_6, %c0_7] : memref<128x1xf32, #tpu.memory_space<vmem>>, vector<128x1xf32>
    %12 = arith.maximumf %11, %10 : vector<128x1xf32>
    %c0_8 = arith.constant 0 : index
    %c0_9 = arith.constant 0 : index
    %13 = vector.load %arg8[%c0_8, %c0_9] : memref<128x1xf32, #tpu.memory_space<vmem>>, vector<128x1xf32>
    %c0_10 = arith.constant 0 : index
    %c0_11 = arith.constant 0 : index
    %14 = vector.load %arg7[%c0_10, %c0_11] : memref<128x1xf32, #tpu.memory_space<vmem>>, vector<128x1xf32>
    %15 = arith.subf %14, %12 : vector<128x1xf32>
    %16 = math.exp %15 : vector<128x1xf32>
    %17 = arith.mulf %13, %16 : vector<128x1xf32>
    %18 = vector.broadcast %12 : vector<128x1xf32> to vector<128x128xf32>
    %19 = arith.subf %5, %18 : vector<128x128xf32>
    %20 = math.exp %19 : vector<128x128xf32>
    %cst_12 = arith.constant dense<0.000000e+00> : vector<128xf32>
    %21 = vector.multi_reduction <add>, %20, %cst_12 [1] : vector<128x128xf32> to vector<128xf32>
    %22 = vector.shape_cast %21 : vector<128xf32> to vector<128x1xf32>
    %23 = arith.addf %17, %22 : vector<128x1xf32>
    %c0_13 = arith.constant 0 : index
    %c0_14 = arith.constant 0 : index
    %24 = vector.load %arg8[%c0_13, %c0_14] : memref<128x1xf32, #tpu.memory_space<vmem>>, vector<128x1xf32>
    tpu.vector_store %arg8[%c0_13, %c0_14], %23 {strides = array<i32>} : memref<128x1xf32, #tpu.memory_space<vmem>>, vector<128x1xf32>,
    %c0_15 = arith.constant 0 : index
    %c0_16 = arith.constant 0 : index
    %25 = vector.load %arg7[%c0_15, %c0_16] : memref<128x1xf32, #tpu.memory_space<vmem>>, vector<128x1xf32>
    tpu.vector_store %arg7[%c0_15, %c0_16], %12 {strides = array<i32>} : memref<128x1xf32, #tpu.memory_space<vmem>>, vector<128x1xf32>,
    %cst_17 = arith.constant dense<0xFF800000> : vector<128xf32>
    %26 = vector.multi_reduction <maximumf>, %5, %cst_17 [0] : vector<128x128xf32> to vector<128xf32>
    %27 = vector.shape_cast %26 : vector<128xf32> to vector<1x128xf32>
    %28 = vector.broadcast %27 : vector<1x128xf32> to vector<128x128xf32>
    %29 = arith.subf %5, %28 : vector<128x128xf32>
    %30 = math.exp %29 : vector<128x128xf32>
    %cst_18 = arith.constant dense<0.000000e+00> : vector<128xf32>
    %31 = vector.multi_reduction <add>, %30, %cst_18 [0] : vector<128x128xf32> to vector<128xf32>
    %32 = vector.shape_cast %31 : vector<128xf32> to vector<1x128xf32>
    %33 = tpu.concatenate %27, %32 in 0 : vector<1x128xf32>, vector<1x128xf32> -> vector<2x128xf32>
    %c0_19 = arith.constant 0 : index
    %c0_20 = arith.constant 0 : index
    %c0_21 = arith.constant 0 : index
    %34 = vector.load %arg6[%c0_19, %c0_20, %c0_21] : memref<1x2x128xf32, #tpu.memory_space<vmem>>, vector<1x2x128xf32>
    %35 = vector.shape_cast %34 : vector<1x2x128xf32> to vector<2x128xf32>
    %36 = vector.shape_cast %33 : vector<2x128xf32> to vector<1x2x128xf32>
    tpu.vector_store %arg6[%c0_19, %c0_20, %c0_21], %36 {strides = array<i32>} : memref<1x2x128xf32, #tpu.memory_space<vmem>>, vector<1x2x128xf32>,
    %37 = arith.cmpi eq, %arg0, %arg1 : i32
    %38 = arith.extui %37 : i1 to i32
    %c0_i32_22 = arith.constant 0 : i32
    %39 = arith.cmpi ne, %38, %c0_i32_22 : i32
    scf.if %39 {
      %43 = tpu.iota {dimensions = array<i32: 0>} : vector<128x128xi32>
      %44 = tpu.iota {dimensions = array<i32: 1>} : vector<128x128xi32>
      %45 = arith.cmpi eq, %43, %44 : vector<128x128xi32>
      %cst_24 = arith.constant 0.000000e+00 : f32
      %46 = vector.broadcast %cst_24 : f32 to vector<128x128xf32>
      %47 = arith.select %45, %5, %46 : vector<128x128xi1>, vector<128x128xf32>
      %cst_25 = arith.constant dense<0.000000e+00> : vector<128xf32>
      %48 = vector.multi_reduction <add>, %47, %cst_25 [0] : vector<128x128xf32> to vector<128xf32>
      %49 = vector.shape_cast %48 : vector<128xf32> to vector<1x128xf32>
      %c0_26 = arith.constant 0 : index
      %c0_27 = arith.constant 0 : index
      %50 = vector.load %arg9[%c0_26, %c0_27] : memref<1x128xf32, #tpu.memory_space<vmem>>, vector<1x128xf32>
      tpu.vector_store %arg9[%c0_26, %c0_27], %49 {strides = array<i32>} : memref<1x128xf32, #tpu.memory_space<vmem>>, vector<1x128xf32>,
    } else {
    }
    %c1_i32 = arith.constant 1 : i32
    %40 = arith.cmpi eq, %arg1, %c1_i32 : i32
    %41 = arith.extui %40 : i1 to i32
    %c0_i32_23 = arith.constant 0 : i32
    %42 = arith.cmpi ne, %41, %c0_i32_23 : i32
    scf.if %42 {
      %c0_24 = arith.constant 0 : index
      %c0_25 = arith.constant 0 : index
      %43 = vector.load %arg8[%c0_24, %c0_25] : memref<128x1xf32, #tpu.memory_space<vmem>>, vector<128x1xf32>
      %44 = math.log %43 : vector<128x1xf32>
      %c0_26 = arith.constant 0 : index
      %c0_27 = arith.constant 0 : index
      %45 = vector.load %arg7[%c0_26, %c0_27] : memref<128x1xf32, #tpu.memory_space<vmem>>, vector<128x1xf32>
      %46 = arith.addf %44, %45 : vector<128x1xf32>
      %47 = tpu.iota {dimensions = array<i32: 0>} : vector<128x128xi32>
      %48 = tpu.iota {dimensions = array<i32: 1>} : vector<128x128xi32>
      %49 = arith.cmpi eq, %47, %48 : vector<128x128xi32>
      %cst_28 = arith.constant 0.000000e+00 : f32
      %50 = vector.shape_cast %46 : vector<128x1xf32> to vector<128x1xf32>
      %51 = vector.broadcast %50 : vector<128x1xf32> to vector<128x128xf32>
      %52 = vector.broadcast %cst_28 : f32 to vector<128x128xf32>
      %53 = arith.select %49, %51, %52 : vector<128x128xi1>, vector<128x128xf32>
      %cst_29 = arith.constant dense<0.000000e+00> : vector<128xf32>
      %54 = vector.multi_reduction <add>, %53, %cst_29 [0] : vector<128x128xf32> to vector<128xf32>
      %55 = vector.shape_cast %54 : vector<128xf32> to vector<1x128xf32>
      %c0_30 = arith.constant 0 : index
      %c0_31 = arith.constant 0 : index
      %56 = vector.load %arg9[%c0_30, %c0_31] : memref<1x128xf32, #tpu.memory_space<vmem>>, vector<1x128xf32>
      %57 = tpu.concatenate %55, %56 in 0 : vector<1x128xf32>, vector<1x128xf32> -> vector<2x128xf32>
      %c0_32 = arith.constant 0 : index
      %c0_33 = arith.constant 0 : index
      %c0_34 = arith.constant 0 : index
      %58 = vector.load %arg5[%c0_32, %c0_33, %c0_34] : memref<1x2x128xf32, #tpu.memory_space<vmem>>, vector<1x2x128xf32>
      %59 = vector.shape_cast %58 : vector<1x2x128xf32> to vector<2x128xf32>
      %60 = vector.shape_cast %57 : vector<2x128xf32> to vector<1x2x128xf32>
      tpu.vector_store %arg5[%c0_32, %c0_33, %c0_34], %60 {strides = array<i32>} : memref<1x2x128xf32, #tpu.memory_space<vmem>>, vector<1x2x128xf32>,
    } else {
    }
    return
  }
  func.func @transform_0(%arg0: i32, %arg1: i32) -> i32 {
    %c0_i32 = arith.constant 0 : i32
    %c0_i32_0 = arith.constant 0 : i32
    return %c0_i32 : i32
  }
  func.func @transform_1(%arg0: i32, %arg1: i32) -> (i32, i32) {
    %c0_i32 = arith.constant 0 : i32
    %c0_i32_0 = arith.constant 0 : i32
    return %arg0, %c0_i32 : i32, i32
  }
  func.func @transform_2(%arg0: i32, %arg1: i32) -> (i32, i32) {
    %c0_i32 = arith.constant 0 : i32
    %c0_i32_0 = arith.constant 0 : i32
    return %arg1, %c0_i32 : i32, i32
  }
  func.func @transform_3(%arg0: i32, %arg1: i32) -> (i32, i32, i32) {
    %c0_i32 = arith.constant 0 : i32
    %c0_i32_0 = arith.constant 0 : i32
    %c0_i32_1 = arith.constant 0 : i32
    return %arg0, %c0_i32, %c0_i32_0 : i32, i32, i32
  }
  func.func @transform_4(%arg0: i32, %arg1: i32) -> (i32, i32, i32) {
    %c0_i32 = arith.constant 0 : i32
    %c0_i32_0 = arith.constant 0 : i32
    return %arg0, %c0_i32, %arg1 : i32, i32, i32
  }
}

</mosaic_0001>

<bundles_post_ra>
// kernel: clip_loss.1
= control target key start
LH: loop header
LB: loop body
LE: loop exit
PB: predicated region body
PF: predicated region fallthrough
CT: control target
= control target key end

     0   :  { %s2688_s0 = inlined_call_operand.<no memory space> [shape: f32[1], index: 0, kind: input, shape index: {}]   ;;  %s2689_s1 = inlined_call_operand.hbm [shape: f32[256,128], index: 1, kind: input, shape index: {}]   ;;  %s2690_s2 = inlined_call_operand.hbm [shape: f32[256,128], index: 2, kind: input, shape index: {}]   ;;  %s2691_s3 = inlined_call_operand.vmem [shape: f32[2,2,128], index: 3, kind: output, shape index: {0}]   ;;  %s2692_s4 = inlined_call_operand.vmem [shape: f32[2,2,256], index: 4, kind: output, shape index: {1}]  }
   0x1   :  { %2704 = sst [smem:[#allocation21_spill]] %s2689_s1 }
   0x2   :  { %10 = sst [smem:[#allocation5]] %s2688_s0 }
   0x3   :  { %11 = vsyncpa [#allocation7], 0 }
   0x4   :  { %13 = vsyncpa [#allocation7 + $0x1], 0 }
   0x5   :  { %14 = vsyncpa [#allocation9], 0 }
   0x6   :  { %16 = vsyncpa [#allocation9 + $0x1], 0  ;;  %s2008_s17 = smov 0   ;;  %s2010_s18 = smov 0  }
   0x7   :  { %s2012_s19 = smov 0   ;;  %s2014_s20 = smov 0  }
   0x8   :  { %s2016_s21 = smov 0   ;;  %s2018_s22 = smov 0  }
   0x9   :  { %s2020_s23 = smov 0   ;;  %s2022_s24 = smov 0  }
   0xa   :  { %s2024_s0 = smov 0   ;;  %s2026_s25 = smov 0  }
   0xb   :  { %s2028_s26 = smov 0  }
   0xc LB: > { %s1438_s27 = sadd.s32 4294967295, %s1970_s26   ;;  %s34_s28 = sadd.s32 1, %s1966_s25  ;;  %s1970_s26 = sphi %s2028_s26, %s22_s26   ;;  %s1966_s25 = sphi %s2026_s25, %s2758_s25   ;;  %s1962_s0 = sphi %s2024_s0, %s2757_s0   ;;  %s1958_s24 = sphi %s2022_s24, %s2756_s24   ;;  %s1954_s23 = sphi %s2020_s23, %s2755_s23   ;;  %s1950_s22 = sphi %s2018_s22, %s2754_s22   ;;  %s1946_s21 = sphi %s2016_s21, %s2753_s21   ;;  %s1942_s20 = sphi %s2014_s20, %s2752_s20   ;;  %s1938_s19 = sphi %s2012_s19, %s2751_s19   ;;  %s1934_s18 = sphi %s2010_s18, %s2750_s18   ;;  %s1930_s17 = sphi %s2008_s17, %s2749_s17  }
   0xd   : > { %p69_p0 = scmp.ne.s32.totalorder %s1950_s22, %s1946_s21  ;;  %p70_p1 = scmp.eq.s32.totalorder %s1970_s26, 0 }
   0xe   : > { %p75_p2 = scmp.ne.s32.totalorder %s1946_s21, %s1942_s20  ;;  %p2067_p3 = scmp.eq.s32.totalorder %s1438_s27, 0 }
   0xf   : > { %p71_p4 = por %p70_p1, %p69_p0  ;;  %p1593_p5 = scmp.lt.s32.totalorder %s1970_s26, 4 }
  0x10   : > { %p2076_p6 = por %p2067_p3, %p75_p2  ;;  %s182_s5 = sand.u32 1, %s1950_s22  }
  0x11   : > { %s1442_s6 = sshll.u32 %s182_s5, 7  ;;  %s1460_s7 = sshll.u32 %s1966_s25, 11 }
  0x12   : > { %s2707_s1 = sld [smem:[#allocation21_spill]]  ;;  %s186_s11 = scalar_lea.vmem [#allocation6], %s1442_s6 }
  0x13   : > { %s193_s12 = sshll.u32 %s186_s11, 4  ;;  %p2087_p7 = pnand %p1593_p5, %p71_p4  ;;  %s194_s12 = int_to_ptr.vmem [resolvable:$true] %s193_s12 }
  0x14   : > { %p1448_p8 = scmp.ge.s32.totalorder %s1970_s26, 1  ;;  %s183_s14 = scalar_lea.sflag [#allocation7], %s182_s5 }
  0x15   : > { %p1822_p9 = pneg %p2087_p7  ;;  %s1833_s15 = scalar_lea.vmem %s194_s12, 2048 }
  0x16   : > { %p1834_p10 = scmp.ne.s32.totalorder %s194_s12, %s1833_s15  ;;  %s1972_s16 = smov [#allocation6]  }
  0x17   : > { %s1838_s20 = sshll.u32 %s1972_s16, 4  ;;  %s1839_s20 = int_to_ptr.vmem [resolvable:$false] %s1838_s20 }
  0x18   : > { %s192_s10 = scalar_lea.hbm %s2707_s1, %s1460_s7  ;;  %p1836_p11 = pnand %p1834_p10, %p1822_p9 }
  0x19   : > { %s1840_s27 = scalar_lea.vmem %s1839_s20, 4096  ;;  %p1841_p13 = scmp.lt.s32.totalorder %s194_s12, %s1839_s20 }
  0x1a   : > { %p1837_p12 = pneg %p1836_p11  ;;  %p1842_p0 = scmp.lt.s32.totalorder %s1840_s27, %s1833_s15 }
  0x1c   : > { %p1843_p2 = por %p1842_p0, %p1841_p13 }
  0x1e   : > { %p1844_p4 = pnand %p1843_p2, %p1837_p12 }
  0x20   : > { %1847 = shalt.err (!%p1844_p4)
}
  0x21   : > { %s2693_s6 = smov 128   ;;  %s2694_s5 = smov 8  }
  0x22   : > { %1589 = dma.hbm_to_vmem [thread:$0]  (!%p2087_p7), %s192_s10, 2048, %s194_s12, %s183_s14, %s2693_s6, %s2693_s6, %s2694_s5  }
  0x23   : > { %p222_p9 = scmp.lt.s32.totalorder %s1970_s26, 5  ;;  %s62_s8 = sadd.s32 1, %s1950_s22 }
  0x24   : > { %s31_s9 = sadd.s32 1, %s1962_s0  ;;  %s88_s11 = sadd.s32 1, %s1938_s19 }
  0x25   : > { %p2102_p10 = pnand %p1448_p8, %p222_p9  ;;  %p32_p11 = scmp.ge.s32.totalorder %s31_s9, 2 }
  0x26   : > { %p95_p12 = scmp.ne.s32.totalorder %s1938_s19, %s1934_s18  ;;  %p101_p13 = scmp.ne.s32.totalorder %s1934_s18, %s1930_s17 }
  0x27   : > { %s2760_s9 = smov (%p32_p11, %s31_s9), 0  ;;  %s2762_s28 = smov (!%p32_p11, %s34_s28), %s1966_s25 }
  0x28   : > { %2710 = sst [smem:[#allocation12_spill]] %s2760_s9  ;;  %s85_s10 = ssub.s32 %s1962_s0, %s2760_s9 }
  0x29   : > { %s203_s12 = sand.u32 1, %s1938_s19   ;;  %p36_p7 = scmp.ge.s32.totalorder %s2762_s28, 2 }
  0x2a   : > { %p86_p8 = scmp.eq.s32.totalorder %s85_s10, 0  ;;  %p2123_p0 = por %p95_p12, %p70_p1 }
  0x2b   : > { %p2129_p2 = por %p101_p13, %p2067_p3  ;;  %s2764_s28 = smov (%p36_p7, %s2762_s28), 0 }
  0x2c   : > { %s2136_s14 = scalar_select %p86_p8, %s1938_s19, %s88_s11  }
  0x2d   : > { %s59_s15 = ssub.s32 %s1966_s25, %s2764_s28  ;;  %s1445_s16 = sshll.u32 %s203_s12, 7 }
  0x2e   : > { %p60_p4 = scmp.eq.s32.totalorder %s59_s15, 0  ;;  %s1461_s20 = sshll.u32 %s1962_s0, 11 }
  0x2f   : > { %s207_s27 = scalar_lea.vmem [#allocation8], %s1445_s16  ;;  %s213_s1 = scalar_lea.hbm %s2690_s2, %s1461_s20 }
  0x30   : > { %s214_s10 = sshll.u32 %s207_s27, 4  ;;  %p2151_p1 = pnand %p1593_p5, %p2123_p0  ;;  %s215_s10 = int_to_ptr.vmem [resolvable:$true] %s214_s10 }
  0x31   : > { %s2142_s6 = scalar_select %p60_p4, %s1950_s22, %s62_s8  }
  0x32   : > { %s204_s11 = scalar_lea.sflag [#allocation9], %s203_s12  ;;  %p1850_p3 = pneg %p2151_p1 }
  0x33   : > { %s1861_s15 = scalar_lea.vmem %s215_s10, 2048  ;;  %s1975_s8 = smov [#allocation8]  }
  0x34   : > { %p1862_p9 = scmp.ne.s32.totalorder %s215_s10, %s1861_s15  ;;  %s1866_s16 = sshll.u32 %s1975_s8, 4  ;;  %s1867_s16 = int_to_ptr.vmem [resolvable:$false] %s1866_s16 }
  0x35   : > { %s1868_s5 = scalar_lea.vmem %s1867_s16, 4096  ;;  %p1869_p13 = scmp.lt.s32.totalorder %s215_s10, %s1867_s16 }
  0x36   : > { %p1864_p11 = pnand %p1862_p9, %p1850_p3  ;;  %p1870_p7 = scmp.lt.s32.totalorder %s1868_s5, %s1861_s15 }
  0x38   : > { %p1865_p12 = pneg %p1864_p11  ;;  %p1871_p8 = por %p1870_p7, %p1869_p13 }
  0x3a   : > { %p1872_p4 = pnand %p1871_p8, %p1865_p12 }
  0x3c   : > { %1875 = shalt.err (!%p1872_p4)
}
  0x3d   : > { %s2714_s13 = smov 8   ;;  %s2715_s20 = smov 128  }
  0x3e   : > { %1592 = dma.hbm_to_vmem [thread:$0]  (!%p2151_p1), %s213_s1, 2048, %s215_s10, %s204_s11, %s2715_s20, %s2715_s20, %s2714_s13  }
  0x3f   : > { %226 = sbr.rel (%p2102_p10) target bundleno = 1084 (0x43c), region = 32 }
  0x44   : > { %s228_s12 = sand.u32 1, %s1946_s21  }
  0x45   : > { %s1449_s27 = sshll.u32 %s228_s12, 7  ;;  %s229_s29 = scalar_lea.sflag [#allocation7], %s228_s12 }
  0x46   : > { %s2165_s8 = scalar_lea.vmem [#allocation6], %s1449_s27 }
  0x47   : > { %1921 = dma.done.wait (%p2076_p6), %s229_s29, 2048  }
  0x48   : > { %1923 = vsyncadd (%p2076_p6), %s229_s29, 4294965248  ;;  %s237_s9 = sand.u32 1, %s1934_s18  }
  0x49   : > { %s1450_s15 = sshll.u32 %s237_s9, 7  ;;  %s238_s1 = scalar_lea.sflag [#allocation9], %s237_s9 }
  0x4a   : > { %s2172_s10 = scalar_lea.vmem [#allocation8], %s1450_s15 }
  0x4b   : > { %1925 = dma.done.wait (%p2129_p2), %s238_s1, 2048  }
  0x4c   : > { %1927 = vsyncadd (%p2129_p2), %s238_s1, 4294965248  ;;  %p280_p5 = scmp.lt.s32.totalorder %s1958_s24, 1  ;;  %p286_p6 = scmp.lt.s32.totalorder %s1954_s23, 1  ;;  %v324_v0 = vld [vmem:[%s2172_s10 + $0x78] sm:$0xff]  ;;  %v323_v1 = vld [vmem:[%s2172_s10 + $0x70] sm:$0xff] }
  0x4d   : > { %1494 = vmatprep.subr.mxu0 %v324_v0  ;;  %1550 = vmatprep.subr.mxu1 %v324_v0  ;;  %v322_v2 = vld [vmem:[%s2172_s10 + $0x68] sm:$0xff]  ;;  %v293_v3 = vld [vmem:[%s2165_s8] sm:$0xff]  ;;  %v320_v6 = vld [vmem:[%s2172_s10 + $0x58] sm:$0xff]  ;;  %s292_s9 = sld [smem:[#allocation5]]  ;;  %p1454_p10 = scmp.ne.s32.totalorder %s1954_s23, 0 }
  0x4e   : > { %s281_s30 = scalar_select %p280_p5, %s1958_s24, 1  ;;  %1495 = vmatpush3.xpose.msra.mxu0 %v324_v0  ;;  %1566 = vmatpush3.xpose.msra.mxu1 %v324_v0  ;;  %v301_v4 = vld [vmem:[%s2165_s8 + $0x40] sm:$0xff]  ;;  %v319_v7 = vld [vmem:[%s2172_s10 + $0x50] sm:$0xff]  ;;  %v318_v8 = vld [vmem:[%s2172_s10 + $0x48] sm:$0xff] }
  0x4f   : > { %s287_s7 = scalar_select %p286_p6, %s1954_s23, 1  ;;  %1496 = vmatprep.subr.mxu0 %v323_v1  ;;  %1551 = vmatprep.subr.mxu1 %v323_v1  ;;  %v321_v5 = vld [vmem:[%s2172_s10 + $0x60] sm:$0xff]  ;;  %v316_v10 = vld [vmem:[%s2172_s10 + $0x38] sm:$0xff]  ;;  %v315_v11 = vld [vmem:[%s2172_s10 + $0x30] sm:$0xff] }
  0x50   : > { %s1451_s11 = sshll.u32 %s281_s30, 1  ;;  %1526 = vmatprep.mubr.f32.mxu0 %v293_v3  ;;  %1538 = vmatprep.mubr.f32.mxu1 %v301_v4  ;;  %v317_v9 = vld [vmem:[%s2172_s10 + $0x40] sm:$0xff]  ;;  %v314_v12 = vld [vmem:[%s2172_s10 + $0x28] sm:$0xff]  ;;  %v312_v14 = vld [vmem:[%s2172_s10 + $0x18] sm:$0xff] }
  0x51   : > { %s2185_s13 = scalar_lea.vmem %s2691_s3, %s1451_s11  ;;  %s289_s17 = sadd.s32 %s1451_s11, %s287_s7  ;;  %v313_v13 = vld [vmem:[%s2172_s10 + $0x20] sm:$0xff]  ;;  %v311_v15 = vld [vmem:[%s2172_s10 + $0x10] sm:$0xff]  ;;  %v310_v16 = vld [vmem:[%s2172_s10 + $0x8] sm:$0xff] }
  0x52   : > { %s1453_s20 = sshll.u32 %s289_s17, 1  ;;  %1497 = vmatpush3.xpose.msra.mxu0 %v323_v1  ;;  %1567 = vmatpush3.xpose.msra.mxu1 %v323_v1  ;;  %v309_v17 = vld [vmem:[%s2172_s10] sm:$0xff]  ;;  %v294_v18 = vld [vmem:[%s2165_s8 + $0x8] sm:$0xff]  ;;  %v295_v20 = vld [vmem:[%s2165_s8 + $0x10] sm:$0xff] }
  0x53   : > { %s2190_s29 = scalar_lea.vmem %s2692_s4, %s1453_s20  ;;  %1498 = vmatprep.subr.mxu0 %v322_v2  ;;  %1552 = vmatprep.subr.mxu1 %v322_v2  ;;  %v302_v19 = vld [vmem:[%s2165_s8 + $0x48] sm:$0xff]  ;;  %v303_v21 = vld [vmem:[%s2165_s8 + $0x50] sm:$0xff]  ;;  %v296_v22 = vld [vmem:[%s2165_s8 + $0x18] sm:$0xff]  ;;  %v470_v32 = vstv %s292_s9 }
  0x54   : > { %v304_v23 = vld [vmem:[%s2165_s8 + $0x58] sm:$0xff]  ;;  %v297_v24 = vld [vmem:[%s2165_s8 + $0x20] sm:$0xff]  ;;  %v298_v26 = vld [vmem:[%s2165_s8 + $0x28] sm:$0xff] }
  0x55   : > { %v305_v25 = vld [vmem:[%s2165_s8 + $0x60] sm:$0xff]  ;;  %v306_v27 = vld [vmem:[%s2165_s8 + $0x68] sm:$0xff]  ;;  %v299_v28 = vld [vmem:[%s2165_s8 + $0x30] sm:$0xff] }
  0x56   : > { %1499 = vmatpush3.xpose.msra.mxu0 %v322_v2  ;;  %1568 = vmatpush3.xpose.msra.mxu1 %v322_v2  ;;  %v307_v29 = vld [vmem:[%s2165_s8 + $0x70] sm:$0xff]  ;;  %v300_v30 = vld [vmem:[%s2165_s8 + $0x38] sm:$0xff] }
  0x57   : > { %1500 = vmatprep.subr.mxu0 %v321_v5  ;;  %1553 = vmatprep.subr.mxu1 %v321_v5  ;;  %v308_v31 = vld [vmem:[%s2165_s8 + $0x78] sm:$0xff] }
  0x5a   : > { %1501 = vmatpush3.xpose.msra.mxu0 %v321_v5  ;;  %1569 = vmatpush3.xpose.msra.mxu1 %v321_v5 }
  0x5b   : > { %1502 = vmatprep.subr.mxu0 %v320_v6  ;;  %1554 = vmatprep.subr.mxu1 %v320_v6 }
  0x5e   : > { %1503 = vmatpush3.xpose.msra.mxu0 %v320_v6  ;;  %1570 = vmatpush3.xpose.msra.mxu1 %v320_v6 }
  0x5f   : > { %1504 = vmatprep.subr.mxu0 %v319_v7  ;;  %1555 = vmatprep.subr.mxu1 %v319_v7 }
  0x62   : > { %1505 = vmatpush3.xpose.msra.mxu0 %v319_v7  ;;  %1571 = vmatpush3.xpose.msra.mxu1 %v319_v7 }
  0x63   : > { %1506 = vmatprep.subr.mxu0 %v318_v8  ;;  %1556 = vmatprep.subr.mxu1 %v318_v8 }
  0x66   : > { %1507 = vmatpush3.xpose.msra.mxu0 %v318_v8  ;;  %1572 = vmatpush3.xpose.msra.mxu1 %v318_v8 }
  0x67   : > { %1508 = vmatprep.subr.mxu0 %v317_v9  ;;  %1557 = vmatprep.subr.mxu1 %v317_v9 }
  0x6a   : > { %1509 = vmatpush3.xpose.msra.mxu0 %v317_v9  ;;  %1573 = vmatpush3.xpose.msra.mxu1 %v317_v9 }
  0x6b   : > { %1510 = vmatprep.subr.mxu0 %v316_v10  ;;  %1558 = vmatprep.subr.mxu1 %v316_v10 }
  0x6e   : > { %1511 = vmatpush3.xpose.msra.mxu0 %v316_v10  ;;  %1574 = vmatpush3.xpose.msra.mxu1 %v316_v10 }
  0x6f   : > { %1512 = vmatprep.subr.mxu0 %v315_v11  ;;  %1559 = vmatprep.subr.mxu1 %v315_v11 }
  0x72   : > { %1513 = vmatpush3.xpose.msra.mxu0 %v315_v11  ;;  %1575 = vmatpush3.xpose.msra.mxu1 %v315_v11 }
  0x73   : > { %1514 = vmatprep.subr.mxu0 %v314_v12  ;;  %1560 = vmatprep.subr.mxu1 %v314_v12 }
  0x76   : > { %1515 = vmatpush3.xpose.msra.mxu0 %v314_v12  ;;  %1576 = vmatpush3.xpose.msra.mxu1 %v314_v12 }
  0x77   : > { %1516 = vmatprep.subr.mxu0 %v313_v13  ;;  %1561 = vmatprep.subr.mxu1 %v313_v13 }
  0x7a   : > { %1517 = vmatpush3.xpose.msra.mxu0 %v313_v13  ;;  %1577 = vmatpush3.xpose.msra.mxu1 %v313_v13 }
  0x7b   : > { %1518 = vmatprep.subr.mxu0 %v312_v14  ;;  %1562 = vmatprep.subr.mxu1 %v312_v14 }
  0x7e   : > { %1519 = vmatpush3.xpose.msra.mxu0 %v312_v14  ;;  %1578 = vmatpush3.xpose.msra.mxu1 %v312_v14 }
  0x7f   : > { %1520 = vmatprep.subr.mxu0 %v311_v15  ;;  %1563 = vmatprep.subr.mxu1 %v311_v15 }
  0x82   : > { %1521 = vmatpush3.xpose.msra.mxu0 %v311_v15  ;;  %1579 = vmatpush3.xpose.msra.mxu1 %v311_v15 }
  0x83   : > { %1522 = vmatprep.subr.mxu0 %v310_v16  ;;  %1564 = vmatprep.subr.mxu1 %v310_v16 }
  0x86   : > { %1523 = vmatpush3.xpose.msra.mxu0 %v310_v16  ;;  %1580 = vmatpush3.xpose.msra.mxu1 %v310_v16 }
  0x87   : > { %1524 = vmatprep.subr.mxu0 %v309_v17  ;;  %1565 = vmatprep.subr.mxu1 %v309_v17 }
  0x8a   : > { %1525 = vmatpush3.xpose.msra.mxu0 %v309_v17  ;;  %1581 = vmatpush3.xpose.msra.mxu1 %v309_v17 }
  0x8d   : > { %1527 = vmatmul.mubr.f32.vlgmr.msra.gmra.mxu0 %v294_v18  ;;  %1539 = vmatmul.mubr.f32.vlgmr.msra.gmra.mxu1 %v302_v19 }
  0x8e   : > { %1529 = vmatprep.mubr.f32.mxu0 %v295_v20  ;;  %1541 = vmatprep.mubr.f32.mxu1 %v303_v21 }
  0x91   : > { %1530 = vmatmul.mubr.f32.gmra.mxu0 %v296_v22  ;;  %1542 = vmatmul.mubr.f32.gmra.mxu1 %v304_v23 }
  0x92   : > { %1532 = vmatprep.mubr.f32.mxu0 %v297_v24  ;;  %1544 = vmatprep.mubr.f32.mxu1 %v305_v25 }
  0x95   : > { %1533 = vmatmul.mubr.f32.gmra.mxu0 %v298_v26  ;;  %1545 = vmatmul.mubr.f32.gmra.mxu1 %v306_v27 }
  0x96   : > { %1535 = vmatprep.mubr.f32.mxu0 %v299_v28  ;;  %1547 = vmatprep.mubr.f32.mxu1 %v307_v29 }
  0x99   : > { %1536 = vmatmul.mubr.f32.gmra.mxu0 %v300_v30  ;;  %1548 = vmatmul.mubr.f32.gmra.mxu1 %v308_v31 }
 0x14d   : > { %v1528_v33 = vpop.f32.mrf.mxu0  ;;  %v1540_v34 = vpop.f32.mrf.mxu1 }
 0x14e   : > { %v2224_v35 = vmul.f32 %v1528_v33, %v470_v32  ;;  %v2226_v36 = vmul.f32 %v1540_v34, %v470_v32 }
 0x14f   : > { %v391_v37 = vpop.f32.mrf.mxu0  ;;  %v431_v38 = vpop.f32.mrf.mxu1 }
 0x150   : > { %2716 = vst [vmem:[#allocation13_spill] sm:$0xff] %v2226_v36  ;;  %v2228_v39 = vmul.f32 %v470_v32, %v391_v37  ;;  %v2230_v40 = vmul.f32 %v470_v32, %v431_v38 }
 0x151   : > { %v1531_v41 = vpop.f32.mrf.mxu0  ;;  %v1543_v42 = vpop.f32.mrf.mxu1 }
 0x152   : > { %2717 = vst [vmem:[#allocation14_spill] sm:$0xff] %v2230_v40  ;;  %v2232_v43 = vmul.f32 %v1531_v41, %v470_v32  ;;  %v2234_v44 = vmul.f32 %v1543_v42, %v470_v32 }
 0x153   : > { %v401_v45 = vpop.f32.mrf.mxu0  ;;  %v441_v46 = vpop.f32.mrf.mxu1 }
 0x154   : > { %2718 = vst [vmem:[#allocation15_spill] sm:$0xff] %v2234_v44  ;;  %v2236_v47 = vmul.f32 %v470_v32, %v401_v45  ;;  %v2238_v48 = vmul.f32 %v470_v32, %v441_v46 }
 0x155   : > { %v1534_v49 = vpop.f32.mrf.mxu0  ;;  %v1546_v50 = vpop.f32.mrf.mxu1 }
 0x156   : > { %2719 = vst [vmem:[#allocation16_spill] sm:$0xff] %v2238_v48  ;;  %v2240_v51 = vmul.f32 %v1534_v49, %v470_v32  ;;  %v2242_v52 = vmul.f32 %v1546_v50, %v470_v32 }
 0x157   : > { %v411_v53 = vpop.f32.mrf.mxu0  ;;  %v451_v54 = vpop.f32.mrf.mxu1 }
 0x158   : > { %v2244_v55 = vmul.f32 %v470_v32, %v411_v53  ;;  %v2246_v56 = vmul.f32 %v470_v32, %v451_v54  ;;  %490 = sbr.rel (%p1454_p10) target bundleno = 366 (0x16e), region = 44 }
 0x159   : > { %v1537_v57 = vpop.f32.mrf.mxu0  ;;  %v1549_v58 = vpop.f32.mrf.mxu1 }
 0x15a   : > { %v2248_v59 = vmul.f32 %v1537_v57, %v470_v32  ;;  %v2250_v60 = vmul.f32 %v1549_v58, %v470_v32 }
 0x15b   : > { %v421_v61 = vpop.f32.mrf.mxu0  ;;  %v461_v62 = vpop.f32.mrf.mxu1 }
 0x15c   : > { %2720 = vst [vmem:[#allocation17_spill] sm:$0xff] %v2248_v59  ;;  %v2252_v63 = vmul.f32 %v470_v32, %v421_v61  ;;  %v2254_v0 = vmul.f32 %v470_v32, %v461_v62 }
 0x15d   : > { %vm491_vm0 = vcmask 7168   ;;  %v1976_v1 = vmov -inf   ;;  %v1977_v2 = vmov 0.0  }
 0x15e   : > { %492 = vst.msk [vmem:[#allocation2] sm:$0xff] %vm491_vm0, %v1976_v1  ;;  %493 = vst.msk [vmem:[#allocation2 + $0x8] sm:$0xff] %vm491_vm0, %v1976_v1 }
 0x15f   : > { %494 = vst.msk [vmem:[#allocation2 + $0x10] sm:$0xff] %vm491_vm0, %v1976_v1  ;;  %495 = vst.msk [vmem:[#allocation2 + $0x18] sm:$0xff] %vm491_vm0, %v1976_v1 }
 0x160   : > { %496 = vst.msk [vmem:[#allocation2 + $0x20] sm:$0xff] %vm491_vm0, %v1976_v1  ;;  %497 = vst.msk [vmem:[#allocation2 + $0x28] sm:$0xff] %vm491_vm0, %v1976_v1 }
 0x161   : > { %498 = vst.msk [vmem:[#allocation2 + $0x30] sm:$0xff] %vm491_vm0, %v1976_v1  ;;  %499 = vst.msk [vmem:[#allocation2 + $0x38] sm:$0xff] %vm491_vm0, %v1976_v1 }
 0x162   : > { %500 = vst.msk [vmem:[#allocation2 + $0x40] sm:$0xff] %vm491_vm0, %v1976_v1  ;;  %501 = vst.msk [vmem:[#allocation2 + $0x48] sm:$0xff] %vm491_vm0, %v1976_v1 }
 0x163   : > { %502 = vst.msk [vmem:[#allocation2 + $0x50] sm:$0xff] %vm491_vm0, %v1976_v1  ;;  %503 = vst.msk [vmem:[#allocation2 + $0x58] sm:$0xff] %vm491_vm0, %v1976_v1 }
 0x164   : > { %504 = vst.msk [vmem:[#allocation2 + $0x60] sm:$0xff] %vm491_vm0, %v1976_v1  ;;  %505 = vst.msk [vmem:[#allocation2 + $0x68] sm:$0xff] %vm491_vm0, %v1976_v1 }
 0x165   : > { %506 = vst.msk [vmem:[#allocation2 + $0x70] sm:$0xff] %vm491_vm0, %v1976_v1  ;;  %507 = vst.msk [vmem:[#allocation2 + $0x78] sm:$0xff] %vm491_vm0, %v1976_v1 }
 0x166   : > { %508 = vst.msk [vmem:[#allocation3] sm:$0xff] %vm491_vm0, %v1977_v2  ;;  %509 = vst.msk [vmem:[#allocation3 + $0x8] sm:$0xff] %vm491_vm0, %v1977_v2 }
 0x167   : > { %510 = vst.msk [vmem:[#allocation3 + $0x10] sm:$0xff] %vm491_vm0, %v1977_v2  ;;  %511 = vst.msk [vmem:[#allocation3 + $0x18] sm:$0xff] %vm491_vm0, %v1977_v2 }
 0x168   : > { %512 = vst.msk [vmem:[#allocation3 + $0x20] sm:$0xff] %vm491_vm0, %v1977_v2  ;;  %513 = vst.msk [vmem:[#allocation3 + $0x28] sm:$0xff] %vm491_vm0, %v1977_v2 }
 0x169   : > { %514 = vst.msk [vmem:[#allocation3 + $0x30] sm:$0xff] %vm491_vm0, %v1977_v2  ;;  %515 = vst.msk [vmem:[#allocation3 + $0x38] sm:$0xff] %vm491_vm0, %v1977_v2 }
 0x16a   : > { %516 = vst.msk [vmem:[#allocation3 + $0x40] sm:$0xff] %vm491_vm0, %v1977_v2  ;;  %517 = vst.msk [vmem:[#allocation3 + $0x48] sm:$0xff] %vm491_vm0, %v1977_v2 }
 0x16b   : > { %518 = vst.msk [vmem:[#allocation3 + $0x50] sm:$0xff] %vm491_vm0, %v1977_v2  ;;  %519 = vst.msk [vmem:[#allocation3 + $0x58] sm:$0xff] %vm491_vm0, %v1977_v2 }
 0x16c   : > { %520 = vst.msk [vmem:[#allocation3 + $0x60] sm:$0xff] %vm491_vm0, %v1977_v2  ;;  %521 = vst.msk [vmem:[#allocation3 + $0x68] sm:$0xff] %vm491_vm0, %v1977_v2 }
 0x16d   : > { %522 = vst.msk [vmem:[#allocation3 + $0x70] sm:$0xff] %vm491_vm0, %v1977_v2  ;;  %523 = vst.msk [vmem:[#allocation3 + $0x78] sm:$0xff] %vm491_vm0, %v1977_v2 }
 0x16e PF: > { %528 = vmax.xlane.f32.xlu1 %v2236_v47  ;;  %524 = vmax.xlane.f32.xlu0 %v2228_v39  ;;  %v1978_v3 = vmov 0   ;;  %v2305_v4 = vld [vmem:[#allocation2 + $0x10] sm:$0xff]  ;;  %v2307_v5 = vld [vmem:[#allocation2] sm:$0xff]  ;;  %vm844_vm1 = vcmask 7168   ;;  %v2315_v10 = vld [vmem:[#allocation2 + $0x18] sm:$0xff]  ;;  %vm967_vm2 = vcmask 1040384   ;;  %p1455_p0 = scmp.ne.s32.totalorder %s1958_s24, %s1954_s23 }
 0x16f   : > { %1688 = vset.pattern.permute.xlu0 %v1978_v3  ;;  %1689 = vset.pattern.permute.xlu1 %v1978_v3  ;;  %v2317_v11 = vld [vmem:[#allocation2 + $0x8] sm:$0xff]  ;;  %v2336_v19 = vld [vmem:[#allocation2 + $0x20] sm:$0xff]  ;;  %v2353_v26 = vld [vmem:[#allocation2 + $0x38] sm:$0xff] }
 0x170   : > { %v2334_v18 = vld [vmem:[#allocation2 + $0x28] sm:$0xff]  ;;  %v2355_v27 = vld [vmem:[#allocation2 + $0x30] sm:$0xff]  ;;  %v2374_v37 = vld [vmem:[#allocation2 + $0x40] sm:$0xff] }
 0x171   : > { %v2372_v34 = vld [vmem:[#allocation2 + $0x48] sm:$0xff]  ;;  %v2391_v50 = vld [vmem:[#allocation2 + $0x58] sm:$0xff]  ;;  %v2393_v53 = vld [vmem:[#allocation2 + $0x50] sm:$0xff] }
 0x172   : > { %530 = vmax.xlane.f32.xlu1 %v2232_v43  ;;  %526 = vmax.xlane.f32.xlu0 %v2224_v35  ;;  %v2411_v2 = vld [vmem:[#allocation2 + $0x68] sm:$0xff]  ;;  %v2413_v3 = vld [vmem:[#allocation2 + $0x60] sm:$0xff] }
 0x176   : > { %534 = vmax.xlane.f32.xlu1 %v2240_v51  ;;  %532 = vmax.xlane.f32.xlu0 %v2244_v55 }
 0x17a   : > { %538 = vmax.xlane.f32.xlu1 %v2248_v59  ;;  %536 = vmax.xlane.f32.xlu0 %v2252_v63 }
 0x17e   : > { %542 = vmax.xlane.f32.xlu1 %v2226_v36  ;;  %540 = vmax.xlane.f32.xlu0 %v2230_v40 }
 0x182   : > { %546 = vmax.xlane.f32.xlu1 %v2234_v44  ;;  %544 = vmax.xlane.f32.xlu0 %v2238_v48 }
 0x186   : > { %550 = vmax.xlane.f32.xlu1 %v2242_v52  ;;  %548 = vmax.xlane.f32.xlu0 %v2246_v56 }
 0x18a   : > { %554 = vmax.xlane.f32.xlu1 %v2250_v60  ;;  %552 = vmax.xlane.f32.xlu0 %v2254_v0 }
 0x1f7   : > { %v529_v6 = vpop.xlane.xlu1 %528  ;;  %v525_v7 = vpop.xlane.xlu0 %524 }
 0x1f8   : > { %v2310_v8 = vmax.f32 %v2305_v4, %v529_v6  ;;  %v2313_v9 = vmax.f32 %v2307_v5, %v525_v7 }
 0x1fa   : > { %863 = vst.msk [vmem:[#allocation2 + $0x10] sm:$0xff] %vm844_vm1, %v2310_v8  ;;  %861 = vst.msk [vmem:[#allocation2] sm:$0xff] %vm844_vm1, %v2313_v9  ;;  %670 = vperm.xlu0 %1688, %v2313_v9  }
 0x1fb   : > { %v531_v14 = vpop.xlane.xlu1 %530  ;;  %v527_v15 = vpop.xlane.xlu0 %526 }
 0x1fc   : > { %v2329_v16 = vmax.f32 %v2315_v10, %v531_v14  ;;  %v2332_v17 = vmax.f32 %v2317_v11, %v527_v15 }
 0x1fe   : > { %864 = vst.msk [vmem:[#allocation2 + $0x18] sm:$0xff] %vm844_vm1, %v2329_v16  ;;  %862 = vst.msk [vmem:[#allocation2 + $0x8] sm:$0xff] %vm844_vm1, %v2332_v17  ;;  %675 = vperm.xlu1 %1689, %v2332_v17  }
 0x1ff   : > { %v535_v22 = vpop.xlane.xlu1 %534  ;;  %v533_v23 = vpop.xlane.xlu0 %532 }
 0x200   : > { %v2348_v24 = vmax.f32 %v2334_v18, %v535_v22  ;;  %v2351_v25 = vmax.f32 %v2336_v19, %v533_v23 }
 0x202   : > { %866 = vst.msk [vmem:[#allocation2 + $0x28] sm:$0xff] %vm844_vm1, %v2348_v24  ;;  %680 = vperm.xlu1 %1689, %v2310_v8   ;;  %865 = vst.msk [vmem:[#allocation2 + $0x20] sm:$0xff] %vm844_vm1, %v2351_v25 }
 0x203   : > { %v539_v30 = vpop.xlane.xlu1 %538  ;;  %v537_v31 = vpop.xlane.xlu0 %536 }
 0x204   : > { %v2367_v32 = vmax.f32 %v2353_v26, %v539_v30  ;;  %v2370_v33 = vmax.f32 %v2355_v27, %v537_v31  ;;  %v2431_v30 = vld [vmem:[#allocation2 + $0x78] sm:$0xff]  ;;  %v2433_v31 = vld [vmem:[#allocation2 + $0x70] sm:$0xff] }
 0x205   : > { %2721 = vst [vmem:[#allocation18_spill] sm:$0xff] %v2433_v31 }
 0x206   : > { %868 = vst.msk [vmem:[#allocation2 + $0x38] sm:$0xff] %vm844_vm1, %v2367_v32  ;;  %685 = vperm.xlu1 %1689, %v2329_v16   ;;  %867 = vst.msk [vmem:[#allocation2 + $0x30] sm:$0xff] %vm844_vm1, %v2370_v33 }
 0x207   : > { %v543_v42 = vpop.xlane.xlu1 %542  ;;  %v541_v45 = vpop.xlane.xlu0 %540 }
 0x208   : > { %v2386_v46 = vmax.f32 %v2372_v34, %v543_v42  ;;  %v2389_v49 = vmax.f32 %v2374_v37, %v541_v45  ;;  %v879_v45 = vmax.f32 %v2236_v47, %v2252_v63  ;;  %v880_v42 = vmax.f32 %v2232_v43, %v2248_v59 }
 0x20a   : > { %870 = vst.msk [vmem:[#allocation2 + $0x48] sm:$0xff] %vm844_vm1, %v2386_v46  ;;  %690 = vperm.xlu1 %1689, %v2351_v25   ;;  %715 = vperm.xlu0 %1688, %v2386_v46   ;;  %869 = vst.msk [vmem:[#allocation2 + $0x40] sm:$0xff] %vm844_vm1, %v2389_v49  ;;  %v883_v57 = vmax.f32 %v879_v45, %v2238_v48  ;;  %v884_v54 = vmax.f32 %v880_v42, %v2234_v44 }
 0x20b   : > { %v547_v58 = vpop.xlane.xlu1 %546  ;;  %v545_v61 = vpop.xlane.xlu0 %544 }
 0x20c   : > { %v2406_v62 = vmax.f32 %v2391_v50, %v547_v58  ;;  %v2409_v1 = vmax.f32 %v2393_v53, %v545_v61  ;;  %v887_v28 = vmax.f32 %v883_v57, %v2254_v0  ;;  %v888_v29 = vmax.f32 %v884_v54, %v2250_v60 }
 0x20e   : > { %872 = vst.msk [vmem:[#allocation2 + $0x58] sm:$0xff] %vm844_vm1, %v2406_v62  ;;  %695 = vperm.xlu1 %1689, %v2348_v24   ;;  %725 = vperm.xlu0 %1688, %v2406_v62   ;;  %871 = vst.msk [vmem:[#allocation2 + $0x50] sm:$0xff] %vm844_vm1, %v2409_v1  ;;  %v890_v12 = vmax.f32 %v887_v28, %v888_v29 }
 0x20f   : > { %v551_v14 = vpop.xlane.xlu1 %550  ;;  %v549_v15 = vpop.xlane.xlu0 %548 }
 0x210   : > { %v2426_v22 = vmax.f32 %v2411_v2, %v551_v14  ;;  %v2429_v23 = vmax.f32 %v2413_v3, %v549_v15 }
 0x212   : > { %874 = vst.msk [vmem:[#allocation2 + $0x68] sm:$0xff] %vm844_vm1, %v2426_v22  ;;  %700 = vperm.xlu1 %1689, %v2370_v33   ;;  %735 = vperm.xlu0 %1688, %v2426_v22   ;;  %873 = vst.msk [vmem:[#allocation2 + $0x60] sm:$0xff] %vm844_vm1, %v2429_v23 }
 0x213   : > { %v555_v58 = vpop.xlane.xlu1 %554  ;;  %v553_v61 = vpop.xlane.xlu0 %552 }
 0x214   : > { %v2446_v14 = vmax.f32 %v2431_v30, %v555_v58  ;;  %v2449_v15 = vmax.f32 %v2433_v31, %v553_v61  ;;  %v877_v58 = vmax.f32 %v2228_v39, %v2244_v55  ;;  %v878_v61 = vmax.f32 %v2224_v35, %v2240_v51 }
 0x216   : > { %2722 = vst [vmem:[#allocation19_spill] sm:$0xff] %v2446_v14  ;;  %2723 = vst [vmem:[#allocation20_spill] sm:$0xff] %v2449_v15  ;;  %705 = vperm.xlu1 %1689, %v2367_v32   ;;  %745 = vperm.xlu0 %1688, %v2446_v14   ;;  %v881_v7 = vmax.f32 %v877_v58, %v2230_v40  ;;  %v882_v6 = vmax.f32 %v878_v61, %v2226_v36 }
 0x217   : > { %876 = vst.msk [vmem:[#allocation2 + $0x78] sm:$0xff] %vm844_vm1, %v2446_v14  ;;  %875 = vst.msk [vmem:[#allocation2 + $0x70] sm:$0xff] %vm844_vm1, %v2449_v15 }
 0x218   : > { %v885_v38 = vmax.f32 %v881_v7, %v2246_v56  ;;  %v886_v41 = vmax.f32 %v882_v6, %v2242_v52 }
 0x21a   : > { %710 = vperm.xlu1 %1689, %v2389_v49   ;;  %v889_v20 = vmax.f32 %v885_v38, %v886_v41 }
 0x21c   : > { %v891_v58 = vmax.f32 %v889_v20, %v890_v12 }
 0x21e   : > { %720 = vperm.xlu1 %1689, %v2409_v1   ;;  %v892_v61 = vrot.slane %v891_v58, 4 }
 0x220   : > { %v893_v45 = vmax.f32 %v891_v58, %v892_v61 }
 0x222   : > { %730 = vperm.xlu1 %1689, %v2429_v23   ;;  %v894_v14 = vrot.slane %v893_v45, 2 }
 0x224   : > { %v895_v54 = vmax.f32 %v893_v45, %v894_v14 }
 0x226   : > { %740 = vperm.xlu1 %1689, %v2449_v15   ;;  %v896_v28 = vrot.slane %v895_v54, 1 }
 0x275   : > { %v671_v21 = vpop.permute.xlu0 %670 }
 0x276   : > { %v748_v13 = vsub.f32 %v2228_v39, %v671_v21 }
 0x278   : > { %v764_v15 = vmul.f32 1.442695, %v748_v13  ;;  %v2485_v13 = vmax.f32 %v895_v54, %v896_v28 }
 0x279   : > { %v676_v31 = vpop.permute.xlu1 %675 }
 0x27a   : > { %1690 = vpow2.f32 %v764_v15  ;;  %v749_v42 = vsub.f32 %v2224_v35, %v676_v31  ;;  %v898_v21 = vsub.f32 %v2228_v39, %v2485_v13  ;;  %v899_v41 = vsub.f32 %v2224_v35, %v2485_v13 }
 0x27b   : > { %v900_v58 = vsub.f32 %v2236_v47, %v2485_v13  ;;  %v902_v28 = vsub.f32 %v2244_v55, %v2485_v13 }
 0x27c   : > { %v766_v7 = vmul.f32 1.442695, %v749_v42  ;;  %v914_v42 = vmul.f32 1.442695, %v898_v21 }
 0x27d   : > { %v681_v6 = vpop.permute.xlu1 %680  ;;  %v918_v54 = vmul.f32 1.442695, %v900_v58  ;;  %v922_v58 = vmul.f32 1.442695, %v902_v28 }
 0x27e   : > { %1692 = vpow2.f32 %v766_v7  ;;  %v750_v57 = vsub.f32 %v2236_v47, %v681_v6  ;;  %v901_v7 = vsub.f32 %v2232_v43, %v2485_v13  ;;  %v916_v6 = vmul.f32 1.442695, %v899_v41 }
 0x280   : > { %v768_v38 = vmul.f32 1.442695, %v750_v57  ;;  %v920_v41 = vmul.f32 1.442695, %v901_v7 }
 0x281   : > { %v686_v29 = vpop.permute.xlu1 %685 }
 0x282   : > { %1694 = vpow2.f32 %v768_v38  ;;  %v751_v12 = vsub.f32 %v2232_v43, %v686_v29 }
 0x284   : > { %v770_v20 = vmul.f32 1.442695, %v751_v12 }
 0x285   : > { %v691_v31 = vpop.permute.xlu1 %690  ;;  %v716_v14 = vpop.permute.xlu0 %715 }
 0x286   : > { %1696 = vpow2.f32 %v770_v20  ;;  %v752_v15 = vsub.f32 %v2244_v55, %v691_v31  ;;  %v757_v12 = vsub.f32 %v2226_v36, %v716_v14  ;;  %v903_v31 = vsub.f32 %v2240_v51, %v2485_v13 }
 0x287   : > { %v1691_v61 = vpop.eup %1690 }
 0x288   : > { %v772_v45 = vmul.f32 1.442695, %v752_v15  ;;  %796 = vadd.xlane.f32.xlu1 %v1691_v61  ;;  %v782_v14 = vmul.f32 1.442695, %v757_v12  ;;  %v924_v7 = vmul.f32 1.442695, %v903_v31 }
 0x289   : > { %v696_v57 = vpop.permute.xlu1 %695  ;;  %v726_v21 = vpop.permute.xlu0 %725 }
 0x28a   : > { %1698 = vpow2.f32 %v772_v45  ;;  %v753_v38 = vsub.f32 %v2240_v51, %v696_v57  ;;  %v904_v45 = vsub.f32 %v2252_v63, %v2485_v13 }
 0x28b   : > { %v1693_v29 = vpop.eup %1692  ;;  %1700 = vpow2.f32 %v914_v42  ;;  %v759_v42 = vsub.f32 %v2234_v44, %v726_v21 }
 0x28c   : > { %v774_v20 = vmul.f32 1.442695, %v753_v38  ;;  %798 = vadd.xlane.f32.xlu0 %v1693_v29  ;;  %1702 = vpow2.f32 %v916_v6  ;;  %v905_v29 = vsub.f32 %v2248_v59, %v2485_v13 }
 0x28d   : > { %v701_v15 = vpop.permute.xlu1 %700  ;;  %1704 = vpow2.f32 %v918_v54  ;;  %v926_v54 = vmul.f32 1.442695, %v904_v45  ;;  %v786_v12 = vmul.f32 1.442695, %v759_v42  ;;  %v736_v21 = vpop.permute.xlu0 %735 }
 0x28e   : > { %1706 = vpow2.f32 %v774_v20  ;;  %v754_v61 = vsub.f32 %v2252_v63, %v701_v15  ;;  %v906_v20 = vsub.f32 %v2230_v40, %v2485_v13  ;;  %v928_v31 = vmul.f32 1.442695, %v905_v29 }
 0x28f   : > { %v1695_v57 = vpop.eup %1694  ;;  %1708 = vpow2.f32 %v920_v41  ;;  %v909_v29 = vsub.f32 %v2234_v44, %v2485_v13 }
 0x290   : > { %v776_v38 = vmul.f32 1.442695, %v754_v61  ;;  %800 = vadd.xlane.f32.xlu0 %v1695_v57  ;;  %1710 = vpow2.f32 %v922_v58  ;;  %v907_v57 = vsub.f32 %v2226_v36, %v2485_v13  ;;  %v930_v58 = vmul.f32 1.442695, %v906_v20 }
 0x291   : > { %v706_v6 = vpop.permute.xlu1 %705 }
 0x292   : > { %1712 = vpow2.f32 %v776_v38  ;;  %v755_v28 = vsub.f32 %v2248_v59, %v706_v6  ;;  %v908_v38 = vsub.f32 %v2238_v48, %v2485_v13 }
 0x293   : > { %v1697_v15 = vpop.eup %1696  ;;  %1714 = vpow2.f32 %v782_v14  ;;  %v932_v14 = vmul.f32 1.442695, %v907_v57 }
 0x294   : > { %v778_v61 = vmul.f32 1.442695, %v755_v28  ;;  %802 = vadd.xlane.f32.xlu1 %v1697_v15  ;;  %1716 = vpow2.f32 %v924_v7  ;;  %v761_v28 = vsub.f32 %v2242_v52, %v736_v21  ;;  %v936_v21 = vmul.f32 1.442695, %v909_v29 }
 0x295   : > { %v711_v41 = vpop.permute.xlu1 %710  ;;  %1718 = vpow2.f32 %v926_v54  ;;  %v746_v54 = vpop.permute.xlu0 %745 }
 0x296   : > { %1720 = vpow2.f32 %v778_v61  ;;  %v756_v45 = vsub.f32 %v2230_v40, %v711_v41  ;;  %v934_v61 = vmul.f32 1.442695, %v908_v38  ;;  %v763_v44 = vsub.f32 %v2250_v60, %v746_v54 }
 0x297   : > { %v1699_v6 = vpop.eup %1698  ;;  %1722 = vpow2.f32 %v786_v12  ;;  %v910_v12 = vsub.f32 %v2246_v56, %v2485_v13 }
 0x298   : > { %v1701_v42 = vpop.eup %1700  ;;  %v780_v15 = vmul.f32 1.442695, %v756_v45  ;;  %804 = vadd.xlane.f32.xlu0 %v1699_v6  ;;  %1724 = vpow2.f32 %v928_v31  ;;  %v790_v6 = vmul.f32 1.442695, %v761_v28 }
 0x299   : > { %v1703_v7 = vpop.eup %1702  ;;  %v721_v20 = vpop.permute.xlu1 %720  ;;  %1726 = vpow2.f32 %v930_v58  ;;  %v911_v58 = vsub.f32 %v2242_v52, %v2485_v13 }
 0x29a   : > { %v1705_v41 = vpop.eup %1704  ;;  %1728 = vpow2.f32 %v780_v15  ;;  %v758_v36 = vsub.f32 %v2238_v48, %v721_v20  ;;  %v946_v45 = vadd.f32 %v1703_v7, %v1701_v42  ;;  %v938_v15 = vmul.f32 1.442695, %v910_v12 }
 0x29b   : > { %v1707_v57 = vpop.eup %1706  ;;  %1730 = vpow2.f32 %v932_v14  ;;  %v912_v14 = vsub.f32 %v2254_v0, %v2485_v13  ;;  %v940_v28 = vmul.f32 1.442695, %v911_v58  ;;  %v794_v7 = vmul.f32 1.442695, %v763_v44 }
 0x29c   : > { %v784_v31 = vmul.f32 1.442695, %v758_v36  ;;  %806 = vadd.xlane.f32.xlu1 %v1707_v57  ;;  %v1709_v38 = vpop.eup %1708  ;;  %1732 = vpow2.f32 %v934_v61  ;;  %v947_v20 = vadd.f32 %v1705_v41, %v946_v45  ;;  %v913_v61 = vsub.f32 %v2250_v60, %v2485_v13 }
 0x29d   : > { %v731_v40 = vpop.permute.xlu1 %730  ;;  %v1711_v48 = vpop.eup %1710  ;;  %v942_v57 = vmul.f32 1.442695, %v912_v14 }
 0x29e   : > { %1734 = vpow2.f32 %v784_v31  ;;  %v760_v59 = vsub.f32 %v2246_v56, %v731_v40  ;;  %v948_v36 = vadd.f32 %v1709_v38, %v947_v20  ;;  %v944_v58 = vmul.f32 1.442695, %v913_v61 }
 0x29f   : > { %v1713_v42 = vpop.eup %1712  ;;  %1736 = vpow2.f32 %v936_v21 }
 0x2a0   : > { %v1715_v29 = vpop.eup %1714  ;;  %1738 = vpow2.f32 %v790_v6  ;;  %v788_v54 = vmul.f32 1.442695, %v760_v59  ;;  %808 = vadd.xlane.f32.xlu0 %v1713_v42  ;;  %v949_v40 = vadd.f32 %v1711_v48, %v948_v36 }
 0x2a1   : > { %v1717_v41 = vpop.eup %1716  ;;  %v741_v12 = vpop.permute.xlu1 %740  ;;  %1740 = vpow2.f32 %v938_v15 }
 0x2a2   : > { %v1719_v45 = vpop.eup %1718  ;;  %1742 = vpow2.f32 %v788_v54  ;;  %v762_v31 = vsub.f32 %v2254_v0, %v741_v12  ;;  %v950_v38 = vadd.f32 %v1717_v41, %v949_v40 }
 0x2a3   : > { %v1721_v21 = vpop.eup %1720  ;;  %1744 = vpow2.f32 %v940_v28 }
 0x2a4   : > { %v1723_v6 = vpop.eup %1722  ;;  %1746 = vpow2.f32 %v794_v7  ;;  %v792_v44 = vmul.f32 1.442695, %v762_v31  ;;  %810 = vadd.xlane.f32.xlu1 %v1721_v21  ;;  %v951_v20 = vadd.f32 %v1719_v45, %v950_v38 }
 0x2a5   : > { %v1725_v59 = vpop.eup %1724  ;;  %1748 = vpow2.f32 %v942_v57 }
 0x2a6   : > { %v1727_v42 = vpop.eup %1726  ;;  %1750 = vpow2.f32 %v792_v44  ;;  %v952_v48 = vadd.f32 %v1725_v59, %v951_v20 }
 0x2a7   : > { %v1729_v15 = vpop.eup %1728  ;;  %1752 = vpow2.f32 %v944_v58 }
 0x2a8   : > { %v1731_v14 = vpop.eup %1730  ;;  %812 = vadd.xlane.f32.xlu0 %v1729_v15  ;;  %814 = vadd.xlane.f32.xlu1 %v1715_v29  ;;  %v953_v36 = vadd.f32 %v1727_v42, %v952_v48 }
 0x2a9   : > { %v1733_v54 = vpop.eup %1732 }
 0x2aa   : > { %v954_v61 = vadd.f32 %v1731_v14, %v953_v36 }
 0x2ab   : > { %v1735_v28 = vpop.eup %1734 }
 0x2ac   : > { %v1737_v41 = vpop.eup %1736  ;;  %816 = vadd.xlane.f32.xlu0 %v1735_v28  ;;  %818 = vadd.xlane.f32.xlu1 %v1723_v6  ;;  %v955_v12 = vadd.f32 %v1733_v54, %v954_v61  ;;  %v2724_v61 = vsub.f32 %v2307_v5, %v2313_v9  ;;  %v2728_v5 = vsub.f32 %v2336_v19, %v2351_v25 }
 0x2ad   : > { %v1739_v7 = vpop.eup %1738 }
 0x2ae   : > { %v1741_v40 = vpop.eup %1740  ;;  %v956_v45 = vadd.f32 %v1737_v41, %v955_v12  ;;  %v620_v41 = vmul.f32 1.442695, %v2724_v61  ;;  %v628_v9 = vmul.f32 1.442695, %v2728_v5  ;;  %v592_v61 = vld [vmem:[#allocation3 + $0x20] sm:$0xff] }
 0x2af   : > { %v1743_v57 = vpop.eup %1742 }
 0x2b0   : > { %v1745_v31 = vpop.eup %1744  ;;  %820 = vadd.xlane.f32.xlu0 %v1743_v57  ;;  %822 = vadd.xlane.f32.xlu1 %v1739_v7  ;;  %v957_v58 = vadd.f32 %v1741_v40, %v956_v45  ;;  %1754 = vpow2.f32 %v620_v41  ;;  %v2725_v7 = vsub.f32 %v2317_v11, %v2332_v17  ;;  %v2726_v40 = vsub.f32 %v2305_v4, %v2310_v8 }
 0x2b1   : > { %v1747_v21 = vpop.eup %1746  ;;  %v2727_v45 = vsub.f32 %v2315_v10, %v2329_v16  ;;  %v2729_v11 = vsub.f32 %v2334_v18, %v2348_v24  ;;  %v2730_v10 = vsub.f32 %v2355_v27, %v2370_v33  ;;  %v2731_v18 = vsub.f32 %v2353_v26, %v2367_v32 }
 0x2b2   : > { %v1749_v38 = vpop.eup %1748  ;;  %v958_v44 = vadd.f32 %v1745_v31, %v957_v58  ;;  %v622_v12 = vmul.f32 1.442695, %v2725_v7  ;;  %v624_v57 = vmul.f32 1.442695, %v2726_v40  ;;  %v2732_v33 = vsub.f32 %v2372_v34, %v2386_v46 }
 0x2b3   : > { %v1751_v29 = vpop.eup %1750  ;;  %v630_v17 = vmul.f32 1.442695, %v2729_v11  ;;  %v632_v16 = vmul.f32 1.442695, %v2730_v10  ;;  %v634_v24 = vmul.f32 1.442695, %v2731_v18  ;;  %v2734_v7 = vsub.f32 %v2391_v50, %v2406_v62 }
 0x2b4   : > { %v1753_v59 = vpop.eup %1752  ;;  %824 = vadd.xlane.f32.xlu0 %v1751_v29  ;;  %826 = vadd.xlane.f32.xlu1 %v1747_v21  ;;  %v959_v20 = vadd.f32 %v1749_v38, %v958_v44  ;;  %1756 = vpow2.f32 %v622_v12  ;;  %v588_v21 = vld [vmem:[#allocation3] sm:$0xff]  ;;  %v589_v38 = vld [vmem:[#allocation3 + $0x8] sm:$0xff]  ;;  %v2735_v34 = vsub.f32 %v2393_v53, %v2409_v1  ;;  %v2737_v50 = vsub.f32 %v2413_v3, %v2429_v23  ;;  %v2738_v11 = vld [vmem:[#allocation19_spill] sm:$0xff] }
 0x2b5   : > { %1758 = vpow2.f32 %v624_v57  ;;  %v642_v12 = vmul.f32 1.442695, %v2734_v7  ;;  %v593_v57 = vld [vmem:[#allocation3 + $0x28] sm:$0xff] }
 0x2b6   : > { %v960_v42 = vadd.f32 %v1753_v59, %v959_v20  ;;  %v590_v59 = vld [vmem:[#allocation3 + $0x10] sm:$0xff]  ;;  %v640_v46 = vmul.f32 1.442695, %v2735_v34  ;;  %v644_v62 = vmul.f32 1.442695, %v2737_v50  ;;  %v601_v7 = vld [vmem:[#allocation3 + $0x68] sm:$0xff] }
 0x2b7   : > { %v602_v50 = vld [vmem:[#allocation3 + $0x70] sm:$0xff] }
 0x2b8   : > { %v961_v6 = vrot.slane %v960_v42, 4 }
 0x2ba   : > { %v962_v15 = vadd.f32 %v961_v6, %v960_v42 }
 0x2bc   : > { %v963_v48 = vrot.slane %v962_v15, 2 }
 0x2bd   : > { %v1755_v31 = vpop.eup %1754 }
 0x2be   : > { %v964_v14 = vadd.f32 %v963_v48, %v962_v15  ;;  %v652_v4 = vmul.f32 %v1755_v31, %v588_v21  ;;  %v591_v48 = vld [vmem:[#allocation3 + $0x18] sm:$0xff]  ;;  %v594_v31 = vld [vmem:[#allocation3 + $0x30] sm:$0xff] }
 0x2c0   : > { %v965_v36 = vrot.slane %v964_v14, 1 }
 0x2c1   : > { %v1757_v8 = vpop.eup %1756 }
 0x2c2   : > { %v966_v54 = vadd.f32 %v965_v36, %v964_v14  ;;  %v653_v19 = vmul.f32 %v1757_v8, %v589_v38  ;;  %v1759_v25 = vpop.eup %1758  ;;  %v638_v14 = vmul.f32 1.442695, %v2732_v33  ;;  %v2733_v36 = vsub.f32 %v2374_v37, %v2389_v49  ;;  %v598_v33 = vld [vmem:[#allocation3 + $0x50] sm:$0xff] }
 0x2c3   : > { %v654_v42 = vmul.f32 %v1759_v25, %v590_v59  ;;  %v596_v59 = vld [vmem:[#allocation3 + $0x40] sm:$0xff] }
 0x2c4   : > { %v968_v28 = vsel %vm967_vm2, %v2485_v13, %v966_v54  ;;  %v626_v13 = vmul.f32 1.442695, %v2727_v45  ;;  %v636_v54 = vmul.f32 1.442695, %v2733_v36 }
 0x2c5   : > { %969 = vst [vmem:[%s2190_s29] sm:$0x3] %v968_v28 }
 0x2c6   : > { %1760 = vpow2.f32 %v626_v13  ;;  %v2736_v13 = vsub.f32 %v2411_v2, %v2426_v22  ;;  %v2740_v2 = vld [vmem:[#allocation18_spill] sm:$0xff]  ;;  %v2741_v22 = vld [vmem:[#allocation20_spill] sm:$0xff] }
 0x2c7   : > { %1762 = vpow2.f32 %v628_v9  ;;  %v2742_v8 = vsub.f32 %v2740_v2, %v2741_v22 }
 0x2c8   : > { %1764 = vpow2.f32 %v630_v17  ;;  %v646_v5 = vmul.f32 1.442695, %v2736_v13  ;;  %v2739_v17 = vsub.f32 %v2431_v30, %v2738_v11 }
 0x2c9   : > { %1766 = vpow2.f32 %v632_v16 }
 0x2ca   : > { %1768 = vpow2.f32 %v634_v24 }
 0x2cb   : > { %1770 = vpow2.f32 %v638_v14 }
 0x2cc   : > { %1772 = vpow2.f32 %v636_v54 }
 0x2cd   : > { %1774 = vpow2.f32 %v642_v12  ;;  %v600_v12 = vld [vmem:[#allocation3 + $0x60] sm:$0xff] }
 0x2ce   : > { %1776 = vpow2.f32 %v640_v46 }
 0x2cf   : > { %1778 = vpow2.f32 %v646_v5  ;;  %v603_v5 = vld [vmem:[#allocation3 + $0x78] sm:$0xff] }
 0x2d0   : > { %1780 = vpow2.f32 %v644_v62 }
 0x2d3   : > { %v1761_v6 = vpop.eup %1760 }
 0x2d4   : > { %v655_v26 = vmul.f32 %v1761_v6, %v591_v48  ;;  %v1763_v32 = vpop.eup %1762 }
 0x2d5   : > { %v656_v37 = vmul.f32 %v1763_v32, %v592_v61  ;;  %v1765_v49 = vpop.eup %1764 }
 0x2d6   : > { %v657_v53 = vmul.f32 %v1765_v49, %v593_v57  ;;  %v1767_v1 = vpop.eup %1766 }
 0x2d7   : > { %v658_v3 = vmul.f32 %v1767_v1, %v594_v31  ;;  %v1769_v23 = vpop.eup %1768 }
 0x2d8   : > { %v1771_v16 = vpop.eup %1770 }
 0x2d9   : > { %v1773_v30 = vpop.eup %1772 }
 0x2da   : > { %v1775_v18 = vpop.eup %1774 }
 0x2db   : > { %v1777_v6 = vpop.eup %1776 }
 0x2dc   : > { %v1779_v54 = vpop.eup %1778  ;;  %v662_v32 = vmul.f32 %v1777_v6, %v598_v33 }
 0x2dd   : > { %v665_v49 = vmul.f32 %v1779_v54, %v601_v7 }
 0x311   : > { %v797_v58 = vpop.xlane.xlu1 %796 }
 0x312   : > { %v828_v29 = vadd.f32 %v797_v58, %v652_v4  ;;  %v650_v4 = vmul.f32 1.442695, %v2739_v17  ;;  %v648_v58 = vmul.f32 1.442695, %v2742_v8 }
 0x314   : > { %845 = vst.msk [vmem:[#allocation3] sm:$0xff] %vm844_vm1, %v828_v29  ;;  %v595_v29 = vld [vmem:[#allocation3 + $0x38] sm:$0xff]  ;;  %1782 = vpow2.f32 %v650_v4 }
 0x315   : > { %v799_v44 = vpop.xlane.xlu0 %798  ;;  %1784 = vpow2.f32 %v648_v58 }
 0x316   : > { %v829_v20 = vadd.f32 %v799_v44, %v653_v19  ;;  %v659_v19 = vmul.f32 %v1769_v23, %v595_v29  ;;  %v597_v44 = vld [vmem:[#allocation3 + $0x48] sm:$0xff] }
 0x317   : > { %v661_v24 = vmul.f32 %v1771_v16, %v597_v44 }
 0x318   : > { %846 = vst.msk [vmem:[#allocation3 + $0x8] sm:$0xff] %vm844_vm1, %v829_v20 }
 0x319   : > { %v801_v15 = vpop.xlane.xlu0 %800 }
 0x31a   : > { %v830_v27 = vadd.f32 %v801_v15, %v654_v42  ;;  %v660_v42 = vmul.f32 %v1773_v30, %v596_v59 }
 0x31c   : > { %847 = vst.msk [vmem:[#allocation3 + $0x10] sm:$0xff] %vm844_vm1, %v830_v27  ;;  %v599_v27 = vld [vmem:[#allocation3 + $0x58] sm:$0xff] }
 0x31d   : > { %v803_v28 = vpop.xlane.xlu1 %802 }
 0x31e   : > { %v831_v41 = vadd.f32 %v803_v28, %v655_v26  ;;  %v663_v26 = vmul.f32 %v1775_v18, %v599_v27  ;;  %v1781_v28 = vpop.eup %1780 }
 0x320   : > { %848 = vst.msk [vmem:[#allocation3 + $0x18] sm:$0xff] %vm844_vm1, %v831_v41 }
 0x321   : > { %v805_v40 = vpop.xlane.xlu0 %804 }
 0x322   : > { %v832_v45 = vadd.f32 %v805_v40, %v656_v37  ;;  %v1783_v37 = vpop.eup %1782  ;;  %v664_v40 = vmul.f32 %v1781_v28, %v600_v12 }
 0x323   : > { %v1785_v57 = vpop.eup %1784  ;;  %v667_v1 = vmul.f32 %v1783_v37, %v603_v5 }
 0x324   : > { %849 = vst.msk [vmem:[#allocation3 + $0x20] sm:$0xff] %vm844_vm1, %v832_v45 }
 0x325   : > { %v807_v9 = vpop.xlane.xlu1 %806 }
 0x326   : > { %v833_v21 = vadd.f32 %v807_v9, %v657_v53  ;;  %v666_v9 = vmul.f32 %v1785_v57, %v602_v50 }
 0x328   : > { %850 = vst.msk [vmem:[#allocation3 + $0x28] sm:$0xff] %vm844_vm1, %v833_v21 }
 0x329   : > { %v809_v38 = vpop.xlane.xlu0 %808 }
 0x32a   : > { %v834_v10 = vadd.f32 %v809_v38, %v658_v3 }
 0x32c   : > { %851 = vst.msk [vmem:[#allocation3 + $0x30] sm:$0xff] %vm844_vm1, %v834_v10 }
 0x32d   : > { %v811_v25 = vpop.xlane.xlu1 %810 }
 0x32e   : > { %v835_v20 = vadd.f32 %v811_v25, %v659_v19 }
 0x330   : > { %852 = vst.msk [vmem:[#allocation3 + $0x38] sm:$0xff] %vm844_vm1, %v835_v20 }
 0x331   : > { %v815_v15 = vpop.xlane.xlu1 %814  ;;  %v813_v48 = vpop.xlane.xlu0 %812 }
 0x332   : > { %v837_v14 = vadd.f32 %v815_v15, %v661_v24  ;;  %v836_v36 = vadd.f32 %v813_v48, %v660_v42 }
 0x334   : > { %854 = vst.msk [vmem:[#allocation3 + $0x48] sm:$0xff] %vm844_vm1, %v837_v14  ;;  %853 = vst.msk [vmem:[#allocation3 + $0x40] sm:$0xff] %vm844_vm1, %v836_v36 }
 0x335   : > { %v819_v61 = vpop.xlane.xlu1 %818  ;;  %v817_v41 = vpop.xlane.xlu0 %816 }
 0x336   : > { %v839_v34 = vadd.f32 %v819_v61, %v663_v26  ;;  %v838_v46 = vadd.f32 %v817_v41, %v662_v32 }
 0x338   : > { %856 = vst.msk [vmem:[#allocation3 + $0x58] sm:$0xff] %vm844_vm1, %v839_v34  ;;  %855 = vst.msk [vmem:[#allocation3 + $0x50] sm:$0xff] %vm844_vm1, %v838_v46 }
 0x339   : > { %v823_v45 = vpop.xlane.xlu1 %822  ;;  %v821_v13 = vpop.xlane.xlu0 %820 }
 0x33a   : > { %v841_v62 = vadd.f32 %v823_v45, %v665_v49  ;;  %v840_v53 = vadd.f32 %v821_v13, %v664_v40 }
 0x33c   : > { %858 = vst.msk [vmem:[#allocation3 + $0x68] sm:$0xff] %vm844_vm1, %v841_v62  ;;  %857 = vst.msk [vmem:[#allocation3 + $0x60] sm:$0xff] %vm844_vm1, %v840_v53  ;;  %973 = sbr.rel (%p1455_p0) target bundleno = 884 (0x374), region = 48 }
 0x33d   : > { %v827_v31 = vpop.xlane.xlu1 %826  ;;  %v825_v21 = vpop.xlane.xlu0 %824 }
 0x33e   : > { %v843_v11 = vadd.f32 %v827_v31, %v667_v1  ;;  %v842_v17 = vadd.f32 %v825_v21, %v666_v9 }
 0x340   : > { %860 = vst.msk [vmem:[#allocation3 + $0x78] sm:$0xff] %vm844_vm1, %v843_v11  ;;  %859 = vst.msk [vmem:[#allocation3 + $0x70] sm:$0xff] %vm844_vm1, %v842_v17 }
 0x341   : > { %v974_v4 = vlaneseq  ;;  %v2743_v48 = vld [vmem:[#allocation17_spill] sm:$0xff]  ;;  %v2744_v14 = vld [vmem:[#allocation14_spill] sm:$0xff]  ;;  %v2746_v61 = vld [vmem:[#allocation16_spill] sm:$0xff] }
 0x342   : > { %v2745_v26 = vld [vmem:[#allocation13_spill] sm:$0xff]  ;;  %v2747_v12 = vld [vmem:[#allocation15_spill] sm:$0xff] }
 0x343   : > { %v975_v2 = vshrl.u32 %v974_v4, 7  ;;  %v992_v8 = vand.u32 127, %v974_v4 }
 0x345   : > { %v976_v22 = vadd.s32 8, %v975_v2  ;;  %v977_v58 = vadd.s32 16, %v975_v2  ;;  %v978_v3 = vadd.s32 24, %v975_v2  ;;  %vm993_vm3 = vcmp.eq.s32.totalorder %v975_v2, %v992_v8 }
 0x346   : > { %v979_v23 = vadd.s32 32, %v975_v2  ;;  %v1009_v38 = vsel %vm993_vm3, %v2228_v39, 0.0  ;;  %v980_v10 = vadd.s32 40, %v975_v2  ;;  %v981_v19 = vadd.s32 48, %v975_v2 }
 0x347   : > { %vm994_vm4 = vcmp.eq.s32.totalorder %v976_v22, %v992_v8  ;;  %vm995_vm5 = vcmp.eq.s32.totalorder %v977_v58, %v992_v8  ;;  %vm996_vm6 = vcmp.eq.s32.totalorder %v978_v3, %v992_v8  ;;  %v982_v44 = vadd.s32 56, %v975_v2 }
 0x348   : > { %v1010_v29 = vsel %vm994_vm4, %v2224_v35, 0.0  ;;  %v1011_v16 = vsel %vm995_vm5, %v2236_v47, 0.0  ;;  %vm997_vm7 = vcmp.eq.s32.totalorder %v979_v23, %v992_v8  ;;  %v1012_v25 = vsel %vm996_vm6, %v2232_v43, 0.0 }
 0x349   : > { %v1025_v30 = vadd.f32 %v1010_v29, %v1009_v38  ;;  %vm998_vm8 = vcmp.eq.s32.totalorder %v980_v10, %v992_v8  ;;  %v1013_v20 = vsel %vm997_vm7, %v2244_v55, 0.0  ;;  %v983_v18 = vadd.s32 64, %v975_v2 }
 0x34a   : > { %vm999_vm9 = vcmp.eq.s32.totalorder %v981_v19, %v992_v8  ;;  %v1014_v39 = vsel %vm998_vm8, %v2240_v51, 0.0  ;;  %v984_v35 = vadd.s32 72, %v975_v2  ;;  %vm1000_vm10 = vcmp.eq.s32.totalorder %v982_v44, %v992_v8 }
 0x34b   : > { %v1026_v59 = vadd.f32 %v1025_v30, %v1011_v16  ;;  %v1015_v47 = vsel %vm999_vm9, %v2252_v63, 0.0  ;;  %v985_v6 = vadd.s32 80, %v975_v2  ;;  %vm1001_vm11 = vcmp.eq.s32.totalorder %v983_v18, %v992_v8 }
 0x34c   : > { %v1016_v43 = vsel %vm1000_vm10, %v2743_v48, 0.0  ;;  %v986_v27 = vadd.s32 88, %v975_v2  ;;  %vm1002_vm12 = vcmp.eq.s32.totalorder %v984_v35, %v992_v8  ;;  %v1017_v55 = vsel %vm1001_vm11, %v2744_v14, 0.0 }
 0x34d   : > { %v1027_v24 = vadd.f32 %v1026_v59, %v1012_v25  ;;  %v987_v36 = vadd.s32 96, %v975_v2  ;;  %vm1003_vm13 = vcmp.eq.s32.totalorder %v985_v6, %v992_v8  ;;  %v1018_v51 = vsel %vm1002_vm12, %v2745_v26, 0.0 }
 0x34e   : > { %v988_v32 = vadd.s32 104, %v975_v2  ;;  %vm1004_vm14 = vcmp.eq.s32.totalorder %v986_v27, %v992_v8  ;;  %v1019_v63 = vsel %vm1003_vm13, %v2746_v61, 0.0  ;;  %v989_v41 = vadd.s32 112, %v975_v2 }
 0x34f   : > { %v1028_v42 = vadd.f32 %v1027_v24, %v1013_v20  ;;  %vm1005_vm15 = vcmp.eq.s32.totalorder %v987_v36, %v992_v8  ;;  %v1020_v34 = vsel %vm1004_vm14, %v2747_v12, 0.0  ;;  %v990_v46 = vadd.s32 120, %v975_v2 }
 0x350   : > { %vm1006_vm0 = vcmp.eq.s32.totalorder %v988_v32, %v992_v8  ;;  %v1021_v49 = vsel %vm1005_vm15, %v2246_v56, 0.0  ;;  %vm1007_vm1 = vcmp.eq.s32.totalorder %v989_v41, %v992_v8 }
 0x351   : > { %v1029_v15 = vadd.f32 %v1028_v42, %v1014_v39  ;;  %v1022_v57 = vsel %vm1006_vm0, %v2242_v52, 0.0  ;;  %vm1008_vm3 = vcmp.eq.s32.totalorder %v990_v46, %v992_v8  ;;  %v1023_v13 = vsel %vm1007_vm1, %v2254_v0, 0.0 }
 0x352   : > { %v1024_v50 = vsel %vm1008_vm3, %v2250_v60, 0.0 }
 0x353   : > { %v1030_v33 = vadd.f32 %v1029_v15, %v1015_v47 }
 0x355   : > { %v1031_v54 = vadd.f32 %v1030_v33, %v1016_v43 }
 0x357   : > { %v1032_v28 = vadd.f32 %v1031_v54, %v1017_v55 }
 0x359   : > { %v1033_v7 = vadd.f32 %v1032_v28, %v1018_v51 }
 0x35b   : > { %v1034_v37 = vadd.f32 %v1033_v7, %v1019_v63 }
 0x35d   : > { %v1035_v40 = vadd.f32 %v1034_v37, %v1020_v34 }
 0x35f   : > { %v1036_v45 = vadd.f32 %v1035_v40, %v1021_v49 }
 0x361   : > { %v1037_v5 = vadd.f32 %v1036_v45, %v1022_v57 }
 0x363   : > { %v1038_v62 = vadd.f32 %v1037_v5, %v1023_v13 }
 0x365   : > { %v1039_v53 = vadd.f32 %v1038_v62, %v1024_v50 }
 0x367   : > { %v1040_v1 = vrot.slane %v1039_v53, 4 }
 0x369   : > { %v1041_v9 = vadd.f32 %v1040_v1, %v1039_v53 }
 0x36b   : > { %v1042_v31 = vrot.slane %v1041_v9, 2 }
 0x36d   : > { %v1043_v21 = vadd.f32 %v1042_v31, %v1041_v9 }
 0x36f   : > { %v1044_v11 = vrot.slane %v1043_v21, 1 }
 0x371   : > { %v1045_v17 = vadd.f32 %v1044_v11, %v1043_v21 }
 0x373   : > { %1046 = vst [vmem:[#allocation4] sm:$0x1] %v1045_v17 }
 0x374 PF: > { %p1456_p2 = scmp.ne.s32.totalorder %s1954_s23, 1 }
 0x376   : > { %1050 = sbr.rel (%p1456_p2) target bundleno = 1084 (0x43c), region = 52 }
 0x37b   : > { %v1053_v52 = vld [vmem:[#allocation3 + $0x10] sm:$0xff]  ;;  %v1051_v56 = vld [vmem:[#allocation3] sm:$0xff]  ;;  %v1979_v4 = vmov 0   ;;  %v1054_v60 = vld [vmem:[#allocation3 + $0x18] sm:$0xff] }
 0x37c   : > { %1787 = vset.pattern.permute.xlu1 %v1979_v4  ;;  %1786 = vset.pattern.permute.xlu0 %v1979_v4  ;;  %1788 = vlog2.f32 %v1053_v52  ;;  %v1052_v0 = vld [vmem:[#allocation3 + $0x8] sm:$0xff]  ;;  %v1055_v22 = vld [vmem:[#allocation3 + $0x20] sm:$0xff]  ;;  %v1058_v8 = vld [vmem:[#allocation3 + $0x38] sm:$0xff] }
 0x37d   : > { %1790 = vlog2.f32 %v1051_v56  ;;  %v1056_v2 = vld [vmem:[#allocation3 + $0x28] sm:$0xff]  ;;  %v1057_v58 = vld [vmem:[#allocation3 + $0x30] sm:$0xff]  ;;  %v1059_v23 = vld [vmem:[#allocation3 + $0x40] sm:$0xff] }
 0x37e   : > { %1792 = vlog2.f32 %v1054_v60  ;;  %v1060_v3 = vld [vmem:[#allocation3 + $0x48] sm:$0xff]  ;;  %v1062_v38 = vld [vmem:[#allocation3 + $0x58] sm:$0xff]  ;;  %v1061_v29 = vld [vmem:[#allocation3 + $0x50] sm:$0xff] }
 0x37f   : > { %1794 = vlog2.f32 %v1052_v0  ;;  %v1101_v16 = vld [vmem:[#allocation2 + $0x10] sm:$0xff]  ;;  %v1099_v25 = vld [vmem:[#allocation2] sm:$0xff]  ;;  %v1102_v20 = vld [vmem:[#allocation2 + $0x18] sm:$0xff] }
 0x380   : > { %1796 = vlog2.f32 %v1056_v2  ;;  %v1064_v18 = vld [vmem:[#allocation3 + $0x68] sm:$0xff]  ;;  %v1063_v47 = vld [vmem:[#allocation3 + $0x60] sm:$0xff]  ;;  %v1066_v26 = vld [vmem:[#allocation3 + $0x78] sm:$0xff] }
 0x381   : > { %1798 = vlog2.f32 %v1055_v22  ;;  %v1100_v42 = vld [vmem:[#allocation2 + $0x8] sm:$0xff]  ;;  %v1103_v32 = vld [vmem:[#allocation2 + $0x20] sm:$0xff]  ;;  %v1065_v28 = vld [vmem:[#allocation3 + $0x70] sm:$0xff] }
 0x382   : > { %1800 = vlog2.f32 %v1058_v8  ;;  %v1104_v36 = vld [vmem:[#allocation2 + $0x28] sm:$0xff]  ;;  %v1106_v12 = vld [vmem:[#allocation2 + $0x38] sm:$0xff]  ;;  %v1105_v37 = vld [vmem:[#allocation2 + $0x30] sm:$0xff] }
 0x383   : > { %1802 = vlog2.f32 %v1057_v58  ;;  %v1108_v13 = vld [vmem:[#allocation2 + $0x48] sm:$0xff]  ;;  %v1107_v62 = vld [vmem:[#allocation2 + $0x40] sm:$0xff]  ;;  %v1110_v21 = vld [vmem:[#allocation2 + $0x58] sm:$0xff] }
 0x384   : > { %1804 = vlog2.f32 %v1060_v3  ;;  %v1109_v52 = vld [vmem:[#allocation2 + $0x50] sm:$0xff]  ;;  %v1112_v2 = vld [vmem:[#allocation2 + $0x68] sm:$0xff]  ;;  %v1111_v58 = vld [vmem:[#allocation2 + $0x60] sm:$0xff] }
 0x385   : > { %1806 = vlog2.f32 %v1059_v23 }
 0x386   : > { %1808 = vlog2.f32 %v1062_v38 }
 0x387   : > { %1810 = vlog2.f32 %v1061_v29  ;;  %v1114_v29 = vld [vmem:[#allocation2 + $0x78] sm:$0xff] }
 0x388   : > { %1812 = vlog2.f32 %v1064_v18 }
 0x389   : > { %v1789_v10 = vpop.eup %1788  ;;  %1814 = vlog2.f32 %v1063_v47 }
 0x38a   : > { %v1791_v19 = vpop.eup %1790  ;;  %v1072_v30 = vmul.f32 0.6931472, %v1789_v10  ;;  %1816 = vlog2.f32 %v1066_v26 }
 0x38b   : > { %v1793_v44 = vpop.eup %1792  ;;  %v1068_v59 = vmul.f32 0.6931472, %v1791_v19  ;;  %1818 = vlog2.f32 %v1065_v28 }
 0x38c   : > { %v1795_v24 = vpop.eup %1794  ;;  %v1117_v39 = vadd.f32 %v1101_v16, %v1072_v30  ;;  %v1074_v35 = vmul.f32 0.6931472, %v1793_v44  ;;  %v1113_v16 = vld [vmem:[#allocation2 + $0x70] sm:$0xff] }
 0x38d   : > { %v1797_v6 = vpop.eup %1796  ;;  %v1115_v15 = vadd.f32 %v1099_v25, %v1068_v59  ;;  %v1070_v48 = vmul.f32 0.6931472, %v1795_v24  ;;  %v1131_v25 = vlaneseq }
 0x38e   : > { %v1799_v43 = vpop.eup %1798  ;;  %1178 = vperm.xlu1 %1787, %v1117_v39   ;;  %v1118_v27 = vadd.f32 %v1102_v20, %v1074_v35  ;;  %v1078_v33 = vmul.f32 0.6931472, %v1797_v6 }
 0x38f   : > { %v1801_v14 = vpop.eup %1800  ;;  %1168 = vperm.xlu0 %1786, %v1115_v15   ;;  %v1116_v55 = vadd.f32 %v1100_v42, %v1070_v48  ;;  %v1076_v54 = vmul.f32 0.6931472, %v1799_v43  ;;  %v2617_v44 = vshrl.u32 %v1131_v25, 7  ;;  %v2619_v59 = vand.u32 127, %v1131_v25 }
 0x390   : > { %v1803_v51 = vpop.eup %1802  ;;  %v1120_v61 = vadd.f32 %v1104_v36, %v1078_v33  ;;  %v1082_v63 = vmul.f32 0.6931472, %v1801_v14 }
 0x391   : > { %v1805_v41 = vpop.eup %1804  ;;  %v1119_v7 = vadd.f32 %v1103_v32, %v1076_v54  ;;  %v1080_v34 = vmul.f32 0.6931472, %v1803_v51  ;;  %v1133_v20 = vadd.s32 8, %v2617_v44  ;;  %v1134_v24 = vadd.s32 16, %v2617_v44 }
 0x392   : > { %1183 = vperm.xlu1 %1787, %v1118_v27   ;;  %v1807_v46 = vpop.eup %1806  ;;  %v1122_v49 = vadd.f32 %v1106_v12, %v1082_v63  ;;  %v1086_v40 = vmul.f32 0.6931472, %v1805_v41  ;;  %vm1150_vm4 = vcmp.eq.s32.totalorder %v2617_v44, %v2619_v59  ;;  %v1135_v35 = vadd.s32 24, %v2617_v44 }
 0x393   : > { %1173 = vperm.xlu0 %1786, %v1116_v55   ;;  %v1809_v57 = vpop.eup %1808  ;;  %v1121_v45 = vadd.f32 %v1105_v37, %v1080_v34  ;;  %v1084_v5 = vmul.f32 0.6931472, %v1807_v46  ;;  %vm1151_vm5 = vcmp.eq.s32.totalorder %v1133_v20, %v2619_v59  ;;  %vm1152_vm6 = vcmp.eq.s32.totalorder %v1134_v24, %v2619_v59 }
 0x394   : > { %v1811_v50 = vpop.eup %1810  ;;  %v1124_v53 = vadd.f32 %v1108_v13, %v1086_v40  ;;  %v1090_v1 = vmul.f32 0.6931472, %v1809_v57  ;;  %v1136_v6 = vadd.s32 32, %v2617_v44  ;;  %vm1153_vm7 = vcmp.eq.s32.totalorder %v1135_v35, %v2619_v59  ;;  %v1457_v35 = vld [vmem:[#allocation4] ss:$0 sm:$0xff] }
 0x395   : > { %v1813_v9 = vpop.eup %1812  ;;  %v1123_v31 = vadd.f32 %v1107_v62, %v1084_v5  ;;  %v1088_v11 = vmul.f32 0.6931472, %v1811_v50  ;;  %v1137_v27 = vadd.s32 40, %v2617_v44  ;;  %v1138_v54 = vadd.s32 48, %v2617_v44 }
 0x396   : > { %1193 = vperm.xlu1 %1787, %v1120_v61   ;;  %v1815_v17 = vpop.eup %1814  ;;  %v1126_v56 = vadd.f32 %v1110_v21, %v1090_v1  ;;  %v1094_v4 = vmul.f32 0.6931472, %v1813_v9  ;;  %vm1154_vm8 = vcmp.eq.s32.totalorder %v1136_v6, %v2619_v59  ;;  %v1139_v32 = vadd.s32 56, %v2617_v44 }
 0x397   : > { %1188 = vperm.xlu0 %1786, %v1119_v7   ;;  %v1817_v60 = vpop.eup %1816  ;;  %v1125_v0 = vadd.f32 %v1109_v52, %v1088_v11  ;;  %v1092_v22 = vmul.f32 0.6931472, %v1815_v17  ;;  %vm1155_vm9 = vcmp.eq.s32.totalorder %v1137_v27, %v2619_v59  ;;  %vm1156_vm10 = vcmp.eq.s32.totalorder %v1138_v54, %v2619_v59 }
 0x398   : > { %v1819_v8 = vpop.eup %1818  ;;  %v1128_v3 = vadd.f32 %v1112_v2, %v1094_v4  ;;  %v1098_v23 = vmul.f32 0.6931472, %v1817_v60  ;;  %v1140_v7 = vadd.s32 64, %v2617_v44  ;;  %vm1157_vm11 = vcmp.eq.s32.totalorder %v1139_v32, %v2619_v59 }
 0x399   : > { %v1127_v38 = vadd.f32 %v1111_v58, %v1092_v22  ;;  %v1096_v10 = vmul.f32 0.6931472, %v1819_v8  ;;  %v1141_v46 = vadd.s32 72, %v2617_v44  ;;  %v1143_v50 = vadd.s32 88, %v2617_v44 }
 0x39a   : > { %1203 = vperm.xlu1 %1787, %v1122_v49   ;;  %v1130_v19 = vadd.f32 %v1114_v29, %v1098_v23  ;;  %vm1158_vm12 = vcmp.eq.s32.totalorder %v1140_v7, %v2619_v59  ;;  %v1145_v17 = vadd.s32 104, %v2617_v44  ;;  %v1147_v8 = vadd.s32 120, %v2617_v44 }
 0x39b   : > { %1198 = vperm.xlu0 %1786, %v1121_v45   ;;  %v1129_v30 = vadd.f32 %v1113_v16, %v1096_v10  ;;  %v1142_v45 = vadd.s32 80, %v2617_v44  ;;  %vm1159_vm13 = vcmp.eq.s32.totalorder %v1141_v46, %v2619_v59  ;;  %vm1161_vm15 = vcmp.eq.s32.totalorder %v1143_v50, %v2619_v59 }
 0x39c   : > { %vm1163_vm1 = vcmp.eq.s32.totalorder %v1145_v17, %v2619_v59 }
 0x39d   : > { %vm1160_vm14 = vcmp.eq.s32.totalorder %v1142_v45, %v2619_v59 }
 0x39e   : > { %1213 = vperm.xlu1 %1787, %v1124_v53  }
 0x39f   : > { %1208 = vperm.xlu0 %1786, %v1123_v31   ;;  %v1144_v31 = vadd.s32 96, %v2617_v44 }
 0x3a1   : > { %vm1162_vm0 = vcmp.eq.s32.totalorder %v1144_v31, %v2619_v59 }
 0x3a2   : > { %1223 = vperm.xlu1 %1787, %v1126_v56  }
 0x3a3   : > { %1218 = vperm.xlu0 %1786, %v1125_v0   ;;  %v1146_v0 = vadd.s32 112, %v2617_v44 }
 0x3a5   : > { %vm1164_vm3 = vcmp.eq.s32.totalorder %v1146_v0, %v2619_v59 }
 0x3a6   : > { %1233 = vperm.xlu1 %1787, %v1128_v3  }
 0x3a7   : > { %1228 = vperm.xlu0 %1786, %v1127_v38  }
 0x3aa   : > { %1243 = vperm.xlu1 %1787, %v1130_v19  }
 0x3ab   : > { %1238 = vperm.xlu0 %1786, %v1129_v30  }
 0x409   : > { %v1179_v18 = vpop.permute.xlu1 %1178 }
 0x40a   : > { %v1169_v39 = vpop.permute.xlu0 %1168  ;;  %v1248_v33 = vsel %vm1152_vm6, %v1179_v18, 0.0 }
 0x40b   : > { %v1246_v15 = vsel %vm1150_vm4, %v1169_v39, 0.0  ;;  %vm1165_vm4 = vcmp.eq.s32.totalorder %v1147_v8, %v2619_v59 }
 0x40d   : > { %v1184_v42 = vpop.permute.xlu1 %1183 }
 0x40e   : > { %v1174_v47 = vpop.permute.xlu0 %1173  ;;  %v1249_v26 = vsel %vm1153_vm7, %v1184_v42, 0.0 }
 0x40f   : > { %v1247_v48 = vsel %vm1151_vm5, %v1174_v47, 0.0 }
 0x410   : > { %v1262_v43 = vadd.f32 %v1247_v48, %v1246_v15 }
 0x411   : > { %v1194_v14 = vpop.permute.xlu1 %1193 }
 0x412   : > { %v1263_v55 = vadd.f32 %v1262_v43, %v1248_v33  ;;  %v1189_v36 = vpop.permute.xlu0 %1188  ;;  %v1251_v12 = vsel %vm1155_vm9, %v1194_v14, 0.0 }
 0x413   : > { %v1250_v28 = vsel %vm1154_vm8, %v1189_v36, 0.0 }
 0x414   : > { %v1264_v51 = vadd.f32 %v1263_v55, %v1249_v26 }
 0x415   : > { %v1204_v61 = vpop.permute.xlu1 %1203 }
 0x416   : > { %v1265_v63 = vadd.f32 %v1264_v51, %v1250_v28  ;;  %v1199_v41 = vpop.permute.xlu0 %1198  ;;  %v1253_v13 = vsel %vm1157_vm11, %v1204_v61, 0.0 }
 0x417   : > { %v1252_v37 = vsel %vm1156_vm10, %v1199_v41, 0.0 }
 0x418   : > { %v1266_v34 = vadd.f32 %v1265_v63, %v1251_v12 }
 0x419   : > { %v1214_v49 = vpop.permute.xlu1 %1213 }
 0x41a   : > { %v1267_v40 = vadd.f32 %v1266_v34, %v1252_v37  ;;  %v1209_v57 = vpop.permute.xlu0 %1208  ;;  %v1255_v21 = vsel %vm1159_vm13, %v1214_v49, 0.0 }
 0x41b   : > { %v1254_v62 = vsel %vm1158_vm12, %v1209_v57, 0.0 }
 0x41c   : > { %v1268_v5 = vadd.f32 %v1267_v40, %v1253_v13 }
 0x41d   : > { %v1224_v53 = vpop.permute.xlu1 %1223 }
 0x41e   : > { %v1269_v1 = vadd.f32 %v1268_v5, %v1254_v62  ;;  %v1219_v9 = vpop.permute.xlu0 %1218  ;;  %v1257_v2 = vsel %vm1161_vm15, %v1224_v53, 0.0 }
 0x41f   : > { %v1256_v52 = vsel %vm1160_vm14, %v1219_v9, 0.0 }
 0x420   : > { %v1270_v11 = vadd.f32 %v1269_v1, %v1255_v21 }
 0x421   : > { %v1234_v4 = vpop.permute.xlu1 %1233 }
 0x422   : > { %v1271_v56 = vadd.f32 %v1270_v11, %v1256_v52  ;;  %v1229_v60 = vpop.permute.xlu0 %1228  ;;  %v1259_v38 = vsel %vm1163_vm1, %v1234_v4, 0.0 }
 0x423   : > { %v1258_v58 = vsel %vm1162_vm0, %v1229_v60, 0.0 }
 0x424   : > { %v1272_v22 = vadd.f32 %v1271_v56, %v1257_v2 }
 0x425   : > { %v1244_v29 = vpop.permute.xlu1 %1243 }
 0x426   : > { %v1273_v3 = vadd.f32 %v1272_v22, %v1258_v58  ;;  %v1239_v23 = vpop.permute.xlu0 %1238  ;;  %v1261_v30 = vsel %vm1165_vm4, %v1244_v29, 0.0 }
 0x427   : > { %v1260_v16 = vsel %vm1164_vm3, %v1239_v23, 0.0 }
 0x428   : > { %v1274_v10 = vadd.f32 %v1273_v3, %v1259_v38 }
 0x42a   : > { %v1275_v19 = vadd.f32 %v1274_v10, %v1260_v16 }
 0x42c   : > { %v1276_v25 = vadd.f32 %v1275_v19, %v1261_v30 }
 0x42e   : > { %v1277_v20 = vrot.slane %v1276_v25, 4 }
 0x430   : > { %v1278_v18 = vadd.f32 %v1277_v20, %v1276_v25 }
 0x432   : > { %v1279_v24 = vrot.slane %v1278_v18, 2 }
 0x434   : > { %v1280_v39 = vadd.f32 %v1279_v24, %v1278_v18 }
 0x436   : > { %v1281_v44 = vrot.slane %v1280_v39, 1 }
 0x438   : > { %v1282_v42 = vadd.f32 %v1281_v44, %v1280_v39 }
 0x43a   : > { %v1290_v47 = vsel %vm967_vm2, %v1282_v42, %v1457_v35 }
 0x43b   : > { %1291 = vst [vmem:[%s2185_s13] sm:$0x3] %v1290_v47 }
 0x43c PF: > { %s22_s26 = sadd.s32 1, %s1970_s26   ;;  %s2748_s8 = sld [smem:[#allocation12_spill]] }
 0x43d   : > { %p19_p1 = scmp.ge.s32.totalorder %s22_s26, 6   ;;  %s2749_s17 = smov %s1934_s18 }
 0x43e   : > { %s2750_s18 = smov %s1938_s19  ;;  %s2751_s19 = smov %s2136_s14 }
 0x43f   : > { %s2752_s20 = smov %s1946_s21  ;;  %s2753_s21 = smov %s1950_s22 }
 0x440   : > { %s2754_s22 = smov %s2142_s6  ;;  %s2755_s23 = smov %s1962_s0 }
 0x441   : > { %s2756_s24 = smov %s1966_s25  ;;  %s2758_s25 = smov %s2764_s28 }
 0x442   : > { %s2757_s0 = smov %s2748_s8  ;;  %21 = sbr.rel (!%p19_p1) target bundleno = 12 (0xc), region = 109 }
 0x447   :  { %1333 = vsyncpa [#allocation7], 1 }
 0x448   :  { %1335 = vsyncpa [#allocation7 + $0x1], 1 }
 0x449   :  { %1336 = vsyncpa [#allocation9], 1 }
 0x44a   :  { %1338 = vsyncpa [#allocation9 + $0x1], 1 }

</bundles_post_ra>
